<compile_context>
chip_gen: v7x
topology: tpu7x:2x2x1
jax: 0.10.0
libtpu: 0.0.40
codegen_flags: <defaults>
</compile_context>

<pallas_src>
import jax
import jax.numpy as jnp
from jax.experimental import pallas as pl
from jax.experimental.pallas import tpu as pltpu


def _make_trans_guide_kernel(Wp, Tp, C):
    # flattened-frame offset of 3x3 tap (ky, kx), k = ky*3 + kx
    offs = [(dy - 1) * Wp + (dx - 1) for dy in range(3) for dx in range(3)]

    def kernel(x_ref, mask_ref, w1_ref, b1_ref, wsa_ref, w2_ref, b2_ref, out_ref):
        x = x_ref[0]              # (6, Tp)  zero-padded frame, spatially flattened
        mask = mask_ref[...]      # (1, Tp)  1.0 on interior pixels, 0.0 on halo/tail

        def shifted(v, off):
            # shifted[:, f] == v[:, f + off]   (cyclic; wraparound only ever lands
            # on halo/tail positions, which are masked or discarded)
            if off == 0:
                return v
            return pltpu.roll(v, (-off) % Tp, 1)

        # ---- Conv2d(6, C, 3, padding=1) + bias ---------------------------------
        acc1 = jnp.dot(w1_ref[0], shifted(x, offs[0]),
                       preferred_element_type=jnp.float32)
        for k in range(1, 9):
            acc1 = acc1 + jnp.dot(w1_ref[k], shifted(x, offs[k]),
                                  preferred_element_type=jnp.float32)
        y = acc1 + b1_ref[...]                           # (C, Tp)
        # nn.LeakyReLU(True): True -> negative_slope = 1.0 -> identity (no-op).

        # ---- SpatialAttention(kernel_size=3) -----------------------------------
        avg = jnp.mean(y, axis=0, keepdims=True)          # (1, Tp)
        mx = jnp.max(y, axis=0, keepdims=True)            # (1, Tp)
        am = jnp.concatenate([avg, mx], axis=0) * mask    # (2, Tp); halo forced to 0

        logit = jnp.sum(wsa_ref[0] * shifted(am, offs[0]), axis=0, keepdims=True)
        for k in range(1, 9):
            logit = logit + jnp.sum(wsa_ref[k] * shifted(am, offs[k]),
                                    axis=0, keepdims=True)
        y2 = (jax.nn.sigmoid(logit) * y) * mask           # (C, Tp); halo zero for conv2

        # ---- Conv2d(C, 3, 3, padding=1) + bias ---------------------------------
        acc2 = jnp.dot(w2_ref[0], shifted(y2, offs[0]),
                       preferred_element_type=jnp.float32)
        for k in range(1, 9):
            acc2 = acc2 + jnp.dot(w2_ref[k], shifted(y2, offs[k]),
                                  preferred_element_type=jnp.float32)
        out_ref[0] = (acc2 + b2_ref[...]).astype(out_ref.dtype)

    return kernel


def trans_guide_forward(x_nchw, params):
    """x_nchw: (N, 6, H, W) float32 (PyTorch layout). Returns (N, 3, H, W)."""
    N, Cin, H, W = x_nchw.shape
    assert Cin == 6
    C = params["w1"].shape[0]
    Hp, Wp = H + 2, W + 2
    T = Hp * Wp
    Tp = ((T + 127) // 128) * 128            # lane-pad flattened frame to 128x

    # --- glue: NCHW -> planar padded-flattened layout (pure XLA, cheap) ---------
    x = x_nchw.astype(jnp.float32)
    xp = jnp.pad(x, ((0, 0), (0, 0), (1, 1), (1, 1)))              # (N,6,Hp,Wp)
    x_flat = jnp.pad(xp.reshape(N, Cin, T), ((0, 0), (0, 0), (0, Tp - T)))

    interior = jnp.zeros((Hp, Wp), jnp.float32).at[1:1 + H, 1:1 + W].set(1.0)
    mask = jnp.pad(interior.reshape(1, T), ((0, 0), (0, Tp - T)))   # (1, Tp)

    def per_tap(w):   # torch (Cout, Cin, 3, 3) -> (9, Cout, Cin), k = ky*3 + kx
        co, ci, kh, kw = w.shape
        return jnp.transpose(w, (2, 3, 0, 1)).reshape(kh * kw, co, ci)

    w1p = per_tap(params["w1"]).astype(jnp.float32)                 # (9, C, 6)
    b1p = params["b1"].reshape(C, 1).astype(jnp.float32)
    # spatial-attention weights as per-tap (2, 1) columns: [avg; max]
    wsap = jnp.transpose(params["wsa"], (2, 3, 1, 0)).reshape(9, 2, 1).astype(jnp.float32)
    w2p = per_tap(params["w2"]).astype(jnp.float32)                 # (9, 3, C)
    b2p = params["b2"].reshape(3, 1).astype(jnp.float32)

    kernel = _make_trans_guide_kernel(Wp, Tp, C)

    out_flat = pl.pallas_call(
        kernel,
        out_shape=jax.ShapeDtypeStruct((N, 3, Tp), jnp.float32),
        grid=(N,),
        in_specs=[
            pl.BlockSpec((1, Cin, Tp), lambda n: (n, 0, 0)),   # x (per image)
            pl.BlockSpec((1, Tp), lambda n: (0, 0)),           # interior mask
            pl.BlockSpec((9, C, Cin), lambda n: (0, 0, 0)),    # w1
            pl.BlockSpec((C, 1), lambda n: (0, 0)),            # b1
            pl.BlockSpec((9, 2, 1), lambda n: (0, 0, 0)),      # spatial-attn w
            pl.BlockSpec((9, 3, C), lambda n: (0, 0, 0)),      # w2
            pl.BlockSpec((3, 1), lambda n: (0, 0)),            # b2
        ],
        out_specs=pl.BlockSpec((1, 3, Tp), lambda n: (n, 0, 0)),
        compiler_params=pltpu.CompilerParams(
            dimension_semantics=("parallel",)),
    )(x_flat, mask, w1p, b1p, wsap, w2p, b2p)

    # back to PyTorch NCHW, dropping halo + lane-pad tail
    out = out_flat[:, :, :T].reshape(N, 3, Hp, Wp)[:, :, 1:1 + H, 1:1 + W]
    return out


def init_params(key, ch=16):
    """Deterministic PyTorch-style init. Torch layouts: conv weight
    (Cout, Cin, k, k), bias (Cout,)."""
    k1, k2, k3, k4, k5 = jax.random.split(key, 5)

    def u(k, shape, fan_in):
        bound = 1.0 / jnp.sqrt(fan_in)
        return jax.random.uniform(k, shape, jnp.float32, -bound, bound)

    return {
        "w1": u(k1, (ch, 6, 3, 3), 6 * 9),
        "b1": u(k2, (ch,), 6 * 9),
        "wsa": u(k3, (1, 2, 3, 3), 2 * 9),
        "w2": u(k4, (3, ch, 3, 3), ch * 9),
        "b2": u(k5, (3,), ch * 9),
    }


if __name__ == "__main__":
    key = jax.random.PRNGKey(0)
    kx, kp = jax.random.split(key)

    N, H, W = 2, 16, 16
    x = jax.random.normal(kx, (N, 6, H, W), jnp.float32)   # NCHW, like torch
    params = init_params(kp, ch=16)

    out = jax.block_until_ready(trans_guide_forward(x, params))
    assert out.shape == (N, 3, H, W), out.shape
    print("KERNEL_OK")
</pallas_src>

<mosaic_0001>
module attributes {stable_mosaic.version = 11 : i64} {
  func.func @kernel(%arg0: i32, %arg1: memref<1x6x384xf32, #tpu.memory_space<vmem>>, %arg2: memref<1x384xf32, #tpu.memory_space<vmem>>, %arg3: memref<9x16x6xf32, #tpu.memory_space<vmem>>, %arg4: memref<16x1xf32, #tpu.memory_space<vmem>>, %arg5: memref<9x2x1xf32, #tpu.memory_space<vmem>>, %arg6: memref<9x3x16xf32, #tpu.memory_space<vmem>>, %arg7: memref<3x1xf32, #tpu.memory_space<vmem>>, %arg8: memref<1x3x384xf32, #tpu.memory_space<vmem>>) attributes {dimension_semantics = [#tpu.dimension_semantics<parallel>], iteration_bounds = array<i64: 2>, scalar_prefetch = 0 : i64, scratch_operands = 0 : i64, tpu.core_type = #tpu.core_type<tc>, window_params = [{transform_indices = @transform_0, window_bounds = array<i64: 1, 6, 384>}, {pipeline_mode = #tpu.pipeline_mode<synchronous>, transform_indices = @transform_1, window_bounds = array<i64: 1, 384>}, {pipeline_mode = #tpu.pipeline_mode<synchronous>, transform_indices = @transform_2, window_bounds = array<i64: 9, 16, 6>}, {pipeline_mode = #tpu.pipeline_mode<synchronous>, transform_indices = @transform_3, window_bounds = array<i64: 16, 1>}, {pipeline_mode = #tpu.pipeline_mode<synchronous>, transform_indices = @transform_4, window_bounds = array<i64: 9, 2, 1>}, {pipeline_mode = #tpu.pipeline_mode<synchronous>, transform_indices = @transform_5, window_bounds = array<i64: 9, 3, 16>}, {pipeline_mode = #tpu.pipeline_mode<synchronous>, transform_indices = @transform_6, window_bounds = array<i64: 3, 1>}, {transform_indices = @transform_7, window_bounds = array<i64: 1, 3, 384>}]} {
    %c0 = arith.constant 0 : index
    %c0_0 = arith.constant 0 : index
    %c0_1 = arith.constant 0 : index
    %0 = vector.load %arg1[%c0, %c0_0, %c0_1] : memref<1x6x384xf32, #tpu.memory_space<vmem>>, vector<1x6x384xf32>
    %1 = vector.shape_cast %0 : vector<1x6x384xf32> to vector<6x384xf32>
    %c0_2 = arith.constant 0 : index
    %c0_3 = arith.constant 0 : index
    %2 = vector.load %arg2[%c0_2, %c0_3] : memref<1x384xf32, #tpu.memory_space<vmem>>, vector<1x384xf32>
    %c0_4 = arith.constant 0 : index
    %c0_5 = arith.constant 0 : index
    %c0_6 = arith.constant 0 : index
    %3 = vector.load %arg3[%c0_4, %c0_5, %c0_6] : memref<9x16x6xf32, #tpu.memory_space<vmem>>, vector<1x16x6xf32>
    %4 = vector.shape_cast %3 : vector<1x16x6xf32> to vector<16x6xf32>
    %c19_i32 = arith.constant 19 : i32
    %5 = tpu.dynamic_rotate %1 by %c19_i32 dim 1 : vector<6x384xf32>, i32 -> vector<6x384xf32>
    %cst = arith.constant dense<0.000000e+00> : vector<16x384xf32>
    %6 = tpu.matmul %4, %5, %cst {dimension_numbers = #tpu.dot_dimension_numbers<[1], [0], [0], [1], [0, 0, 1, 1], [], []>} : vector<16x6xf32>, vector<6x384xf32>, vector<16x384xf32> -> vector<16x384xf32>
    %c1 = arith.constant 1 : index
    %c0_7 = arith.constant 0 : index
    %c0_8 = arith.constant 0 : index
    %7 = vector.load %arg3[%c1, %c0_7, %c0_8] : memref<9x16x6xf32, #tpu.memory_space<vmem>>, vector<1x16x6xf32>
    %8 = vector.shape_cast %7 : vector<1x16x6xf32> to vector<16x6xf32>
    %c18_i32 = arith.constant 18 : i32
    %9 = tpu.dynamic_rotate %1 by %c18_i32 dim 1 : vector<6x384xf32>, i32 -> vector<6x384xf32>
    %cst_9 = arith.constant dense<0.000000e+00> : vector<16x384xf32>
    %10 = tpu.matmul %8, %9, %cst_9 {dimension_numbers = #tpu.dot_dimension_numbers<[1], [0], [0], [1], [0, 0, 1, 1], [], []>} : vector<16x6xf32>, vector<6x384xf32>, vector<16x384xf32> -> vector<16x384xf32>
    %11 = arith.addf %6, %10 : vector<16x384xf32>
    %c2 = arith.constant 2 : index
    %c0_10 = arith.constant 0 : index
    %c0_11 = arith.constant 0 : index
    %12 = vector.load %arg3[%c2, %c0_10, %c0_11] : memref<9x16x6xf32, #tpu.memory_space<vmem>>, vector<1x16x6xf32>
    %13 = vector.shape_cast %12 : vector<1x16x6xf32> to vector<16x6xf32>
    %c17_i32 = arith.constant 17 : i32
    %14 = tpu.dynamic_rotate %1 by %c17_i32 dim 1 : vector<6x384xf32>, i32 -> vector<6x384xf32>
    %cst_12 = arith.constant dense<0.000000e+00> : vector<16x384xf32>
    %15 = tpu.matmul %13, %14, %cst_12 {dimension_numbers = #tpu.dot_dimension_numbers<[1], [0], [0], [1], [0, 0, 1, 1], [], []>} : vector<16x6xf32>, vector<6x384xf32>, vector<16x384xf32> -> vector<16x384xf32>
    %16 = arith.addf %11, %15 : vector<16x384xf32>
    %c3 = arith.constant 3 : index
    %c0_13 = arith.constant 0 : index
    %c0_14 = arith.constant 0 : index
    %17 = vector.load %arg3[%c3, %c0_13, %c0_14] : memref<9x16x6xf32, #tpu.memory_space<vmem>>, vector<1x16x6xf32>
    %18 = vector.shape_cast %17 : vector<1x16x6xf32> to vector<16x6xf32>
    %c1_i32 = arith.constant 1 : i32
    %19 = tpu.dynamic_rotate %1 by %c1_i32 dim 1 : vector<6x384xf32>, i32 -> vector<6x384xf32>
    %cst_15 = arith.constant dense<0.000000e+00> : vector<16x384xf32>
    %20 = tpu.matmul %18, %19, %cst_15 {dimension_numbers = #tpu.dot_dimension_numbers<[1], [0], [0], [1], [0, 0, 1, 1], [], []>} : vector<16x6xf32>, vector<6x384xf32>, vector<16x384xf32> -> vector<16x384xf32>
    %21 = arith.addf %16, %20 : vector<16x384xf32>
    %c4 = arith.constant 4 : index
    %c0_16 = arith.constant 0 : index
    %c0_17 = arith.constant 0 : index
    %22 = vector.load %arg3[%c4, %c0_16, %c0_17] : memref<9x16x6xf32, #tpu.memory_space<vmem>>, vector<1x16x6xf32>
    %23 = vector.shape_cast %22 : vector<1x16x6xf32> to vector<16x6xf32>
    %cst_18 = arith.constant dense<0.000000e+00> : vector<16x384xf32>
    %24 = tpu.matmul %23, %1, %cst_18 {dimension_numbers = #tpu.dot_dimension_numbers<[1], [0], [0], [1], [0, 0, 1, 1], [], []>} : vector<16x6xf32>, vector<6x384xf32>, vector<16x384xf32> -> vector<16x384xf32>
    %25 = arith.addf %21, %24 : vector<16x384xf32>
    %c5 = arith.constant 5 : index
    %c0_19 = arith.constant 0 : index
    %c0_20 = arith.constant 0 : index
    %26 = vector.load %arg3[%c5, %c0_19, %c0_20] : memref<9x16x6xf32, #tpu.memory_space<vmem>>, vector<1x16x6xf32>
    %27 = vector.shape_cast %26 : vector<1x16x6xf32> to vector<16x6xf32>
    %c383_i32 = arith.constant 383 : i32
    %28 = tpu.dynamic_rotate %1 by %c383_i32 dim 1 : vector<6x384xf32>, i32 -> vector<6x384xf32>
    %cst_21 = arith.constant dense<0.000000e+00> : vector<16x384xf32>
    %29 = tpu.matmul %27, %28, %cst_21 {dimension_numbers = #tpu.dot_dimension_numbers<[1], [0], [0], [1], [0, 0, 1, 1], [], []>} : vector<16x6xf32>, vector<6x384xf32>, vector<16x384xf32> -> vector<16x384xf32>
    %30 = arith.addf %25, %29 : vector<16x384xf32>
    %c6 = arith.constant 6 : index
    %c0_22 = arith.constant 0 : index
    %c0_23 = arith.constant 0 : index
    %31 = vector.load %arg3[%c6, %c0_22, %c0_23] : memref<9x16x6xf32, #tpu.memory_space<vmem>>, vector<1x16x6xf32>
    %32 = vector.shape_cast %31 : vector<1x16x6xf32> to vector<16x6xf32>
    %c367_i32 = arith.constant 367 : i32
    %33 = tpu.dynamic_rotate %1 by %c367_i32 dim 1 : vector<6x384xf32>, i32 -> vector<6x384xf32>
    %cst_24 = arith.constant dense<0.000000e+00> : vector<16x384xf32>
    %34 = tpu.matmul %32, %33, %cst_24 {dimension_numbers = #tpu.dot_dimension_numbers<[1], [0], [0], [1], [0, 0, 1, 1], [], []>} : vector<16x6xf32>, vector<6x384xf32>, vector<16x384xf32> -> vector<16x384xf32>
    %35 = arith.addf %30, %34 : vector<16x384xf32>
    %c7 = arith.constant 7 : index
    %c0_25 = arith.constant 0 : index
    %c0_26 = arith.constant 0 : index
    %36 = vector.load %arg3[%c7, %c0_25, %c0_26] : memref<9x16x6xf32, #tpu.memory_space<vmem>>, vector<1x16x6xf32>
    %37 = vector.shape_cast %36 : vector<1x16x6xf32> to vector<16x6xf32>
    %c366_i32 = arith.constant 366 : i32
    %38 = tpu.dynamic_rotate %1 by %c366_i32 dim 1 : vector<6x384xf32>, i32 -> vector<6x384xf32>
    %cst_27 = arith.constant dense<0.000000e+00> : vector<16x384xf32>
    %39 = tpu.matmul %37, %38, %cst_27 {dimension_numbers = #tpu.dot_dimension_numbers<[1], [0], [0], [1], [0, 0, 1, 1], [], []>} : vector<16x6xf32>, vector<6x384xf32>, vector<16x384xf32> -> vector<16x384xf32>
    %40 = arith.addf %35, %39 : vector<16x384xf32>
    %c8 = arith.constant 8 : index
    %c0_28 = arith.constant 0 : index
    %c0_29 = arith.constant 0 : index
    %41 = vector.load %arg3[%c8, %c0_28, %c0_29] : memref<9x16x6xf32, #tpu.memory_space<vmem>>, vector<1x16x6xf32>
    %42 = vector.shape_cast %41 : vector<1x16x6xf32> to vector<16x6xf32>
    %c365_i32 = arith.constant 365 : i32
    %43 = tpu.dynamic_rotate %1 by %c365_i32 dim 1 : vector<6x384xf32>, i32 -> vector<6x384xf32>
    %cst_30 = arith.constant dense<0.000000e+00> : vector<16x384xf32>
    %44 = tpu.matmul %42, %43, %cst_30 {dimension_numbers = #tpu.dot_dimension_numbers<[1], [0], [0], [1], [0, 0, 1, 1], [], []>} : vector<16x6xf32>, vector<6x384xf32>, vector<16x384xf32> -> vector<16x384xf32>
    %45 = arith.addf %40, %44 : vector<16x384xf32>
    %c0_31 = arith.constant 0 : index
    %c0_32 = arith.constant 0 : index
    %46 = vector.load %arg4[%c0_31, %c0_32] : memref<16x1xf32, #tpu.memory_space<vmem>>, vector<16x1xf32>
    %47 = vector.broadcast %46 : vector<16x1xf32> to vector<16x384xf32>
    %48 = arith.addf %45, %47 : vector<16x384xf32>
    %cst_33 = arith.constant dense<0.000000e+00> : vector<384xf32>
    %49 = vector.multi_reduction <add>, %48, %cst_33 [0] : vector<16x384xf32> to vector<384xf32>
    %50 = vector.shape_cast %49 : vector<384xf32> to vector<1x384xf32>
    %cst_34 = arith.constant 1.600000e+01 : f32
    %51 = vector.broadcast %cst_34 : f32 to vector<1x384xf32>
    %52 = arith.divf %50, %51 : vector<1x384xf32>
    %cst_35 = arith.constant dense<0xFF800000> : vector<384xf32>
    %53 = vector.multi_reduction <maximumf>, %48, %cst_35 [0] : vector<16x384xf32> to vector<384xf32>
    %54 = vector.shape_cast %53 : vector<384xf32> to vector<1x384xf32>
    %55 = tpu.concatenate %52, %54 in 0 : vector<1x384xf32>, vector<1x384xf32> -> vector<2x384xf32>
    %56 = vector.broadcast %2 : vector<1x384xf32> to vector<2x384xf32>
    %57 = arith.mulf %55, %56 : vector<2x384xf32>
    %c0_36 = arith.constant 0 : index
    %c0_37 = arith.constant 0 : index
    %c0_38 = arith.constant 0 : index
    %58 = vector.load %arg5[%c0_36, %c0_37, %c0_38] : memref<9x2x1xf32, #tpu.memory_space<vmem>>, vector<1x2x1xf32>
    %59 = vector.shape_cast %58 : vector<1x2x1xf32> to vector<2x1xf32>
    %c19_i32_39 = arith.constant 19 : i32
    %60 = tpu.dynamic_rotate %57 by %c19_i32_39 dim 1 : vector<2x384xf32>, i32 -> vector<2x384xf32>
    %61 = vector.broadcast %59 : vector<2x1xf32> to vector<2x384xf32>
    %62 = arith.mulf %61, %60 : vector<2x384xf32>
    %cst_40 = arith.constant dense<0.000000e+00> : vector<384xf32>
    %63 = vector.multi_reduction <add>, %62, %cst_40 [0] : vector<2x384xf32> to vector<384xf32>
    %64 = vector.shape_cast %63 : vector<384xf32> to vector<1x384xf32>
    %c1_41 = arith.constant 1 : index
    %c0_42 = arith.constant 0 : index
    %c0_43 = arith.constant 0 : index
    %65 = vector.load %arg5[%c1_41, %c0_42, %c0_43] : memref<9x2x1xf32, #tpu.memory_space<vmem>>, vector<1x2x1xf32>
    %66 = vector.shape_cast %65 : vector<1x2x1xf32> to vector<2x1xf32>
    %c18_i32_44 = arith.constant 18 : i32
    %67 = tpu.dynamic_rotate %57 by %c18_i32_44 dim 1 : vector<2x384xf32>, i32 -> vector<2x384xf32>
    %68 = vector.broadcast %66 : vector<2x1xf32> to vector<2x384xf32>
    %69 = arith.mulf %68, %67 : vector<2x384xf32>
    %cst_45 = arith.constant dense<0.000000e+00> : vector<384xf32>
    %70 = vector.multi_reduction <add>, %69, %cst_45 [0] : vector<2x384xf32> to vector<384xf32>
    %71 = vector.shape_cast %70 : vector<384xf32> to vector<1x384xf32>
    %72 = arith.addf %64, %71 : vector<1x384xf32>
    %c2_46 = arith.constant 2 : index
    %c0_47 = arith.constant 0 : index
    %c0_48 = arith.constant 0 : index
    %73 = vector.load %arg5[%c2_46, %c0_47, %c0_48] : memref<9x2x1xf32, #tpu.memory_space<vmem>>, vector<1x2x1xf32>
    %74 = vector.shape_cast %73 : vector<1x2x1xf32> to vector<2x1xf32>
    %c17_i32_49 = arith.constant 17 : i32
    %75 = tpu.dynamic_rotate %57 by %c17_i32_49 dim 1 : vector<2x384xf32>, i32 -> vector<2x384xf32>
    %76 = vector.broadcast %74 : vector<2x1xf32> to vector<2x384xf32>
    %77 = arith.mulf %76, %75 : vector<2x384xf32>
    %cst_50 = arith.constant dense<0.000000e+00> : vector<384xf32>
    %78 = vector.multi_reduction <add>, %77, %cst_50 [0] : vector<2x384xf32> to vector<384xf32>
    %79 = vector.shape_cast %78 : vector<384xf32> to vector<1x384xf32>
    %80 = arith.addf %72, %79 : vector<1x384xf32>
    %c3_51 = arith.constant 3 : index
    %c0_52 = arith.constant 0 : index
    %c0_53 = arith.constant 0 : index
    %81 = vector.load %arg5[%c3_51, %c0_52, %c0_53] : memref<9x2x1xf32, #tpu.memory_space<vmem>>, vector<1x2x1xf32>
    %82 = vector.shape_cast %81 : vector<1x2x1xf32> to vector<2x1xf32>
    %c1_i32_54 = arith.constant 1 : i32
    %83 = tpu.dynamic_rotate %57 by %c1_i32_54 dim 1 : vector<2x384xf32>, i32 -> vector<2x384xf32>
    %84 = vector.broadcast %82 : vector<2x1xf32> to vector<2x384xf32>
    %85 = arith.mulf %84, %83 : vector<2x384xf32>
    %cst_55 = arith.constant dense<0.000000e+00> : vector<384xf32>
    %86 = vector.multi_reduction <add>, %85, %cst_55 [0] : vector<2x384xf32> to vector<384xf32>
    %87 = vector.shape_cast %86 : vector<384xf32> to vector<1x384xf32>
    %88 = arith.addf %80, %87 : vector<1x384xf32>
    %c4_56 = arith.constant 4 : index
    %c0_57 = arith.constant 0 : index
    %c0_58 = arith.constant 0 : index
    %89 = vector.load %arg5[%c4_56, %c0_57, %c0_58] : memref<9x2x1xf32, #tpu.memory_space<vmem>>, vector<1x2x1xf32>
    %90 = vector.shape_cast %89 : vector<1x2x1xf32> to vector<2x1xf32>
    %91 = vector.broadcast %90 : vector<2x1xf32> to vector<2x384xf32>
    %92 = arith.mulf %91, %57 : vector<2x384xf32>
    %cst_59 = arith.constant dense<0.000000e+00> : vector<384xf32>
    %93 = vector.multi_reduction <add>, %92, %cst_59 [0] : vector<2x384xf32> to vector<384xf32>
    %94 = vector.shape_cast %93 : vector<384xf32> to vector<1x384xf32>
    %95 = arith.addf %88, %94 : vector<1x384xf32>
    %c5_60 = arith.constant 5 : index
    %c0_61 = arith.constant 0 : index
    %c0_62 = arith.constant 0 : index
    %96 = vector.load %arg5[%c5_60, %c0_61, %c0_62] : memref<9x2x1xf32, #tpu.memory_space<vmem>>, vector<1x2x1xf32>
    %97 = vector.shape_cast %96 : vector<1x2x1xf32> to vector<2x1xf32>
    %c383_i32_63 = arith.constant 383 : i32
    %98 = tpu.dynamic_rotate %57 by %c383_i32_63 dim 1 : vector<2x384xf32>, i32 -> vector<2x384xf32>
    %99 = vector.broadcast %97 : vector<2x1xf32> to vector<2x384xf32>
    %100 = arith.mulf %99, %98 : vector<2x384xf32>
    %cst_64 = arith.constant dense<0.000000e+00> : vector<384xf32>
    %101 = vector.multi_reduction <add>, %100, %cst_64 [0] : vector<2x384xf32> to vector<384xf32>
    %102 = vector.shape_cast %101 : vector<384xf32> to vector<1x384xf32>
    %103 = arith.addf %95, %102 : vector<1x384xf32>
    %c6_65 = arith.constant 6 : index
    %c0_66 = arith.constant 0 : index
    %c0_67 = arith.constant 0 : index
    %104 = vector.load %arg5[%c6_65, %c0_66, %c0_67] : memref<9x2x1xf32, #tpu.memory_space<vmem>>, vector<1x2x1xf32>
    %105 = vector.shape_cast %104 : vector<1x2x1xf32> to vector<2x1xf32>
    %c367_i32_68 = arith.constant 367 : i32
    %106 = tpu.dynamic_rotate %57 by %c367_i32_68 dim 1 : vector<2x384xf32>, i32 -> vector<2x384xf32>
    %107 = vector.broadcast %105 : vector<2x1xf32> to vector<2x384xf32>
    %108 = arith.mulf %107, %106 : vector<2x384xf32>
    %cst_69 = arith.constant dense<0.000000e+00> : vector<384xf32>
    %109 = vector.multi_reduction <add>, %108, %cst_69 [0] : vector<2x384xf32> to vector<384xf32>
    %110 = vector.shape_cast %109 : vector<384xf32> to vector<1x384xf32>
    %111 = arith.addf %103, %110 : vector<1x384xf32>
    %c7_70 = arith.constant 7 : index
    %c0_71 = arith.constant 0 : index
    %c0_72 = arith.constant 0 : index
    %112 = vector.load %arg5[%c7_70, %c0_71, %c0_72] : memref<9x2x1xf32, #tpu.memory_space<vmem>>, vector<1x2x1xf32>
    %113 = vector.shape_cast %112 : vector<1x2x1xf32> to vector<2x1xf32>
    %c366_i32_73 = arith.constant 366 : i32
    %114 = tpu.dynamic_rotate %57 by %c366_i32_73 dim 1 : vector<2x384xf32>, i32 -> vector<2x384xf32>
    %115 = vector.broadcast %113 : vector<2x1xf32> to vector<2x384xf32>
    %116 = arith.mulf %115, %114 : vector<2x384xf32>
    %cst_74 = arith.constant dense<0.000000e+00> : vector<384xf32>
    %117 = vector.multi_reduction <add>, %116, %cst_74 [0] : vector<2x384xf32> to vector<384xf32>
    %118 = vector.shape_cast %117 : vector<384xf32> to vector<1x384xf32>
    %119 = arith.addf %111, %118 : vector<1x384xf32>
    %c8_75 = arith.constant 8 : index
    %c0_76 = arith.constant 0 : index
    %c0_77 = arith.constant 0 : index
    %120 = vector.load %arg5[%c8_75, %c0_76, %c0_77] : memref<9x2x1xf32, #tpu.memory_space<vmem>>, vector<1x2x1xf32>
    %121 = vector.shape_cast %120 : vector<1x2x1xf32> to vector<2x1xf32>
    %c365_i32_78 = arith.constant 365 : i32
    %122 = tpu.dynamic_rotate %57 by %c365_i32_78 dim 1 : vector<2x384xf32>, i32 -> vector<2x384xf32>
    %123 = vector.broadcast %121 : vector<2x1xf32> to vector<2x384xf32>
    %124 = arith.mulf %123, %122 : vector<2x384xf32>
    %cst_79 = arith.constant dense<0.000000e+00> : vector<384xf32>
    %125 = vector.multi_reduction <add>, %124, %cst_79 [0] : vector<2x384xf32> to vector<384xf32>
    %126 = vector.shape_cast %125 : vector<384xf32> to vector<1x384xf32>
    %127 = arith.addf %119, %126 : vector<1x384xf32>
    %128 = arith.negf %127 : vector<1x384xf32>
    %129 = math.exp %128 : vector<1x384xf32>
    %cst_80 = arith.constant 1.000000e+00 : f32
    %130 = vector.broadcast %cst_80 : f32 to vector<1x384xf32>
    %131 = arith.addf %130, %129 : vector<1x384xf32>
    %132 = arith.divf %130, %131 : vector<1x384xf32>
    %133 = vector.broadcast %132 : vector<1x384xf32> to vector<16x384xf32>
    %134 = arith.mulf %133, %48 : vector<16x384xf32>
    %135 = vector.broadcast %2 : vector<1x384xf32> to vector<16x384xf32>
    %136 = arith.mulf %134, %135 : vector<16x384xf32>
    %c0_81 = arith.constant 0 : index
    %c0_82 = arith.constant 0 : index
    %c0_83 = arith.constant 0 : index
    %137 = vector.load %arg6[%c0_81, %c0_82, %c0_83] : memref<9x3x16xf32, #tpu.memory_space<vmem>>, vector<1x3x16xf32>
    %138 = vector.shape_cast %137 : vector<1x3x16xf32> to vector<3x16xf32>
    %c19_i32_84 = arith.constant 19 : i32
    %139 = tpu.dynamic_rotate %136 by %c19_i32_84 dim 1 : vector<16x384xf32>, i32 -> vector<16x384xf32>
    %cst_85 = arith.constant dense<0.000000e+00> : vector<3x384xf32>
    %140 = tpu.matmul %138, %139, %cst_85 {dimension_numbers = #tpu.dot_dimension_numbers<[1], [0], [0], [1], [0, 0, 1, 1], [], []>} : vector<3x16xf32>, vector<16x384xf32>, vector<3x384xf32> -> vector<3x384xf32>
    %c1_86 = arith.constant 1 : index
    %c0_87 = arith.constant 0 : index
    %c0_88 = arith.constant 0 : index
    %141 = vector.load %arg6[%c1_86, %c0_87, %c0_88] : memref<9x3x16xf32, #tpu.memory_space<vmem>>, vector<1x3x16xf32>
    %142 = vector.shape_cast %141 : vector<1x3x16xf32> to vector<3x16xf32>
    %c18_i32_89 = arith.constant 18 : i32
    %143 = tpu.dynamic_rotate %136 by %c18_i32_89 dim 1 : vector<16x384xf32>, i32 -> vector<16x384xf32>
    %cst_90 = arith.constant dense<0.000000e+00> : vector<3x384xf32>
    %144 = tpu.matmul %142, %143, %cst_90 {dimension_numbers = #tpu.dot_dimension_numbers<[1], [0], [0], [1], [0, 0, 1, 1], [], []>} : vector<3x16xf32>, vector<16x384xf32>, vector<3x384xf32> -> vector<3x384xf32>
    %145 = arith.addf %140, %144 : vector<3x384xf32>
    %c2_91 = arith.constant 2 : index
    %c0_92 = arith.constant 0 : index
    %c0_93 = arith.constant 0 : index
    %146 = vector.load %arg6[%c2_91, %c0_92, %c0_93] : memref<9x3x16xf32, #tpu.memory_space<vmem>>, vector<1x3x16xf32>
    %147 = vector.shape_cast %146 : vector<1x3x16xf32> to vector<3x16xf32>
    %c17_i32_94 = arith.constant 17 : i32
    %148 = tpu.dynamic_rotate %136 by %c17_i32_94 dim 1 : vector<16x384xf32>, i32 -> vector<16x384xf32>
    %cst_95 = arith.constant dense<0.000000e+00> : vector<3x384xf32>
    %149 = tpu.matmul %147, %148, %cst_95 {dimension_numbers = #tpu.dot_dimension_numbers<[1], [0], [0], [1], [0, 0, 1, 1], [], []>} : vector<3x16xf32>, vector<16x384xf32>, vector<3x384xf32> -> vector<3x384xf32>
    %150 = arith.addf %145, %149 : vector<3x384xf32>
    %c3_96 = arith.constant 3 : index
    %c0_97 = arith.constant 0 : index
    %c0_98 = arith.constant 0 : index
    %151 = vector.load %arg6[%c3_96, %c0_97, %c0_98] : memref<9x3x16xf32, #tpu.memory_space<vmem>>, vector<1x3x16xf32>
    %152 = vector.shape_cast %151 : vector<1x3x16xf32> to vector<3x16xf32>
    %c1_i32_99 = arith.constant 1 : i32
    %153 = tpu.dynamic_rotate %136 by %c1_i32_99 dim 1 : vector<16x384xf32>, i32 -> vector<16x384xf32>
    %cst_100 = arith.constant dense<0.000000e+00> : vector<3x384xf32>
    %154 = tpu.matmul %152, %153, %cst_100 {dimension_numbers = #tpu.dot_dimension_numbers<[1], [0], [0], [1], [0, 0, 1, 1], [], []>} : vector<3x16xf32>, vector<16x384xf32>, vector<3x384xf32> -> vector<3x384xf32>
    %155 = arith.addf %150, %154 : vector<3x384xf32>
    %c4_101 = arith.constant 4 : index
    %c0_102 = arith.constant 0 : index
    %c0_103 = arith.constant 0 : index
    %156 = vector.load %arg6[%c4_101, %c0_102, %c0_103] : memref<9x3x16xf32, #tpu.memory_space<vmem>>, vector<1x3x16xf32>
    %157 = vector.shape_cast %156 : vector<1x3x16xf32> to vector<3x16xf32>
    %cst_104 = arith.constant dense<0.000000e+00> : vector<3x384xf32>
    %158 = tpu.matmul %157, %136, %cst_104 {dimension_numbers = #tpu.dot_dimension_numbers<[1], [0], [0], [1], [0, 0, 1, 1], [], []>} : vector<3x16xf32>, vector<16x384xf32>, vector<3x384xf32> -> vector<3x384xf32>
    %159 = arith.addf %155, %158 : vector<3x384xf32>
    %c5_105 = arith.constant 5 : index
    %c0_106 = arith.constant 0 : index
    %c0_107 = arith.constant 0 : index
    %160 = vector.load %arg6[%c5_105, %c0_106, %c0_107] : memref<9x3x16xf32, #tpu.memory_space<vmem>>, vector<1x3x16xf32>
    %161 = vector.shape_cast %160 : vector<1x3x16xf32> to vector<3x16xf32>
    %c383_i32_108 = arith.constant 383 : i32
    %162 = tpu.dynamic_rotate %136 by %c383_i32_108 dim 1 : vector<16x384xf32>, i32 -> vector<16x384xf32>
    %cst_109 = arith.constant dense<0.000000e+00> : vector<3x384xf32>
    %163 = tpu.matmul %161, %162, %cst_109 {dimension_numbers = #tpu.dot_dimension_numbers<[1], [0], [0], [1], [0, 0, 1, 1], [], []>} : vector<3x16xf32>, vector<16x384xf32>, vector<3x384xf32> -> vector<3x384xf32>
    %164 = arith.addf %159, %163 : vector<3x384xf32>
    %c6_110 = arith.constant 6 : index
    %c0_111 = arith.constant 0 : index
    %c0_112 = arith.constant 0 : index
    %165 = vector.load %arg6[%c6_110, %c0_111, %c0_112] : memref<9x3x16xf32, #tpu.memory_space<vmem>>, vector<1x3x16xf32>
    %166 = vector.shape_cast %165 : vector<1x3x16xf32> to vector<3x16xf32>
    %c367_i32_113 = arith.constant 367 : i32
    %167 = tpu.dynamic_rotate %136 by %c367_i32_113 dim 1 : vector<16x384xf32>, i32 -> vector<16x384xf32>
    %cst_114 = arith.constant dense<0.000000e+00> : vector<3x384xf32>
    %168 = tpu.matmul %166, %167, %cst_114 {dimension_numbers = #tpu.dot_dimension_numbers<[1], [0], [0], [1], [0, 0, 1, 1], [], []>} : vector<3x16xf32>, vector<16x384xf32>, vector<3x384xf32> -> vector<3x384xf32>
    %169 = arith.addf %164, %168 : vector<3x384xf32>
    %c7_115 = arith.constant 7 : index
    %c0_116 = arith.constant 0 : index
    %c0_117 = arith.constant 0 : index
    %170 = vector.load %arg6[%c7_115, %c0_116, %c0_117] : memref<9x3x16xf32, #tpu.memory_space<vmem>>, vector<1x3x16xf32>
    %171 = vector.shape_cast %170 : vector<1x3x16xf32> to vector<3x16xf32>
    %c366_i32_118 = arith.constant 366 : i32
    %172 = tpu.dynamic_rotate %136 by %c366_i32_118 dim 1 : vector<16x384xf32>, i32 -> vector<16x384xf32>
    %cst_119 = arith.constant dense<0.000000e+00> : vector<3x384xf32>
    %173 = tpu.matmul %171, %172, %cst_119 {dimension_numbers = #tpu.dot_dimension_numbers<[1], [0], [0], [1], [0, 0, 1, 1], [], []>} : vector<3x16xf32>, vector<16x384xf32>, vector<3x384xf32> -> vector<3x384xf32>
    %174 = arith.addf %169, %173 : vector<3x384xf32>
    %c8_120 = arith.constant 8 : index
    %c0_121 = arith.constant 0 : index
    %c0_122 = arith.constant 0 : index
    %175 = vector.load %arg6[%c8_120, %c0_121, %c0_122] : memref<9x3x16xf32, #tpu.memory_space<vmem>>, vector<1x3x16xf32>
    %176 = vector.shape_cast %175 : vector<1x3x16xf32> to vector<3x16xf32>
    %c365_i32_123 = arith.constant 365 : i32
    %177 = tpu.dynamic_rotate %136 by %c365_i32_123 dim 1 : vector<16x384xf32>, i32 -> vector<16x384xf32>
    %cst_124 = arith.constant dense<0.000000e+00> : vector<3x384xf32>
    %178 = tpu.matmul %176, %177, %cst_124 {dimension_numbers = #tpu.dot_dimension_numbers<[1], [0], [0], [1], [0, 0, 1, 1], [], []>} : vector<3x16xf32>, vector<16x384xf32>, vector<3x384xf32> -> vector<3x384xf32>
    %179 = arith.addf %174, %178 : vector<3x384xf32>
    %c0_125 = arith.constant 0 : index
    %c0_126 = arith.constant 0 : index
    %180 = vector.load %arg7[%c0_125, %c0_126] : memref<3x1xf32, #tpu.memory_space<vmem>>, vector<3x1xf32>
    %181 = vector.broadcast %180 : vector<3x1xf32> to vector<3x384xf32>
    %182 = arith.addf %179, %181 : vector<3x384xf32>
    %c0_127 = arith.constant 0 : index
    %c0_128 = arith.constant 0 : index
    %c0_129 = arith.constant 0 : index
    %183 = vector.load %arg8[%c0_127, %c0_128, %c0_129] : memref<1x3x384xf32, #tpu.memory_space<vmem>>, vector<1x3x384xf32>
    %184 = vector.shape_cast %183 : vector<1x3x384xf32> to vector<3x384xf32>
    %185 = vector.shape_cast %182 : vector<3x384xf32> to vector<1x3x384xf32>
    tpu.vector_store %arg8[%c0_127, %c0_128, %c0_129], %185 {strides = array<i32>} : memref<1x3x384xf32, #tpu.memory_space<vmem>>, vector<1x3x384xf32>,
    return
  }
  func.func @transform_0(%arg0: i32) -> (i32, i32, i32) {
    %c0_i32 = arith.constant 0 : i32
    %c0_i32_0 = arith.constant 0 : i32
    %c0_i32_1 = arith.constant 0 : i32
    return %arg0, %c0_i32, %c0_i32_0 : i32, i32, i32
  }
  func.func @transform_1(%arg0: i32) -> (i32, i32) {
    %c0_i32 = arith.constant 0 : i32
    %c0_i32_0 = arith.constant 0 : i32
    %c0_i32_1 = arith.constant 0 : i32
    return %c0_i32, %c0_i32_0 : i32, i32
  }
  func.func @transform_2(%arg0: i32) -> (i32, i32, i32) {
    %c0_i32 = arith.constant 0 : i32
    %c0_i32_0 = arith.constant 0 : i32
    %c0_i32_1 = arith.constant 0 : i32
    %c0_i32_2 = arith.constant 0 : i32
    return %c0_i32, %c0_i32_0, %c0_i32_1 : i32, i32, i32
  }
  func.func @transform_3(%arg0: i32) -> (i32, i32) {
    %c0_i32 = arith.constant 0 : i32
    %c0_i32_0 = arith.constant 0 : i32
    %c0_i32_1 = arith.constant 0 : i32
    return %c0_i32, %c0_i32_0 : i32, i32
  }
  func.func @transform_4(%arg0: i32) -> (i32, i32, i32) {
    %c0_i32 = arith.constant 0 : i32
    %c0_i32_0 = arith.constant 0 : i32
    %c0_i32_1 = arith.constant 0 : i32
    %c0_i32_2 = arith.constant 0 : i32
    return %c0_i32, %c0_i32_0, %c0_i32_1 : i32, i32, i32
  }
  func.func @transform_5(%arg0: i32) -> (i32, i32, i32) {
    %c0_i32 = arith.constant 0 : i32
    %c0_i32_0 = arith.constant 0 : i32
    %c0_i32_1 = arith.constant 0 : i32
    %c0_i32_2 = arith.constant 0 : i32
    return %c0_i32, %c0_i32_0, %c0_i32_1 : i32, i32, i32
  }
  func.func @transform_6(%arg0: i32) -> (i32, i32) {
    %c0_i32 = arith.constant 0 : i32
    %c0_i32_0 = arith.constant 0 : i32
    %c0_i32_1 = arith.constant 0 : i32
    return %c0_i32, %c0_i32_0 : i32, i32
  }
  func.func @transform_7(%arg0: i32) -> (i32, i32, i32) {
    %c0_i32 = arith.constant 0 : i32
    %c0_i32_0 = arith.constant 0 : i32
    %c0_i32_1 = arith.constant 0 : i32
    return %arg0, %c0_i32, %c0_i32_0 : i32, i32, i32
  }
}

</mosaic_0001>

<bundles_post_ra>
// kernel: tpu_custom_call.1
= control target key start
LH: loop header
LB: loop body
LE: loop exit
PB: predicated region body
PF: predicated region fallthrough
CT: control target
= control target key end

     0   :  { %s4609_s24 = smov 0   ;;  %s5455_s0 = inlined_call_operand.vmem [shape: f32[2,6,384], index: 0, kind: input, shape index: {}]   ;;  %s5456_s1 = inlined_call_operand.vmem [shape: f32[1,384], index: 1, kind: input, shape index: {}]   ;;  %s5457_s2 = inlined_call_operand.vmem [shape: f32[9,16,6], index: 2, kind: input, shape index: {}]   ;;  %s5458_s3 = inlined_call_operand.vmem [shape: f32[16,1], index: 3, kind: input, shape index: {}]   ;;  %s5459_s4 = inlined_call_operand.vmem [shape: f32[9,2,1], index: 4, kind: input, shape index: {}]   ;;  %s5460_s5 = inlined_call_operand.vmem [shape: f32[9,3,16], index: 5, kind: input, shape index: {}]   ;;  %s5461_s6 = inlined_call_operand.vmem [shape: f32[3,1], index: 6, kind: input, shape index: {}]   ;;  %s5462_s7 = inlined_call_operand.vmem [shape: f32[2,3,384], index: 7, kind: output, shape index: {}]  }
   0x1 LB: > { %s3979_s25 = sadd.s32 4294967295, %s4555_s24   ;;  %p3983_p0 = scmp.ge.s32.totalorder %s4555_s24, 1  ;;  %s4555_s24 = sphi %s4609_s24, %s17_s24  }
   0x2   : > { %p237_p1 = scmp.lt.s32.totalorder %s4555_s24, 3 }
   0x4   : > { %p238_p2 = pnand %p3983_p0, %p237_p1 }
   0x5   : > { %p269_p3 = scmp.lt.s32.totalorder (!%p238_p2), %s3979_s25, 1  ;;  %v4620_v0 = vld [vmem:[%s5457_s2 + $0x10] sm:$0xff] (!%p238_p2)  ;;  %vm310_vm0 = vcmask (!%p238_p2), 48128   ;;  %v5463_v1 = vmov (!%p238_p2), 0.0   ;;  %s4558_s9 = smov (!%p238_p2), 18   ;;  %v1939_v5 = vld [vmem:[%s5458_s3 + $0x8] sm:$0xff] (!%p238_p2)  ;;  %v291_v17 = vlaneseq (!%p238_p2) }
   0x6   : > { %241 = sbr.rel (%p238_p2) target bundleno = 1075 (0x433), region = 48  ;;  %391 = vmatprep.mubr.f32.mxu0 (!%p238_p2), %v5463_v1  ;;  %4160 = vmatprep.mubr.msk.f32.mxu1 (!%p238_p2), %vm310_vm0, %v4620_v0  ;;  %s4559_s10 = smov (!%p238_p2), 19   ;;  %v1938_v6 = vld [vmem:[%s5458_s3] sm:$0xff] (!%p238_p2)  ;;  %v4566_v7 = vmov (!%p238_p2), 0   ;;  %v4068_v12 = vld [vmem:[%s5459_s4 + $0x8] sm:$0x3] (!%p238_p2) }
   0x7   : > { %s4560_s11 = smov (!%p238_p2), 17   ;;  %s4561_s12 = smov (!%p238_p2), 1   ;;  %4416 = vset.pattern.permute.xlu1 (!%p238_p2), %v4566_v7  ;;  %4415 = vset.pattern.permute.xlu0 (!%p238_p2), %v4566_v7  ;;  %v2025_v8 = vld [vmem:[%s5459_s4] sm:$0x3] (!%p238_p2)  ;;  %v4065_v9 = vld [vmem:[%s5459_s4 + $0x2] sm:$0x3] (!%p238_p2) }
   0x8   : > { %s4562_s13 = smov (!%p238_p2), 127   ;;  %s4563_s14 = smov (!%p238_p2), 111   ;;  %v4066_v10 = vld [vmem:[%s5459_s4 + $0x4] sm:$0x3] (!%p238_p2)  ;;  %v4067_v11 = vld [vmem:[%s5459_s4 + $0x6] sm:$0x3] (!%p238_p2) }
   0x9   : > { %s4564_s15 = smov (!%p238_p2), 110   ;;  %s4565_s16 = smov (!%p238_p2), 109   ;;  %v4071_v13 = vld [vmem:[%s5459_s4 + $0xe] sm:$0x3] (!%p238_p2)  ;;  %v4069_v14 = vld [vmem:[%s5459_s4 + $0xa] sm:$0x3] (!%p238_p2) }
   0xa   : > { %v4072_v15 = vld [vmem:[%s5459_s4 + $0x10] sm:$0x3] (!%p238_p2)  ;;  %v4070_v16 = vld [vmem:[%s5459_s4 + $0xc] sm:$0x3] (!%p238_p2)  ;;  %v4719_v18 = vand.u32 (!%p238_p2), 127, %v291_v17  ;;  %vm317_vm2 = vcmask (!%p238_p2), 1045504  }
   0xb   : > { %v3987_v25 = vld [vmem:[%s5457_s2 + $0x18] sm:$0xff] (!%p238_p2)  ;;  %v283_v27 = vld [vmem:[%s5457_s2] sm:$0xff] (!%p238_p2)  ;;  %v284_v36 = vld [vmem:[%s5457_s2 + $0x8] sm:$0xff] (!%p238_p2)  ;;  %vm2002_vm10 = vcmask (!%p238_p2), 1040384   ;;  %vm2043_vm11 = vcmask (!%p238_p2), 1041408   ;;  %vm4568_vm12 = vmmov (!%p238_p2), 0  }
   0xc   : > { %vm306_vm1 = vcmp.lt.s32.totalorder (!%p238_p2), %v4719_v18, 18  ;;  %vm293_vm3 = vcmp.lt.s32.totalorder (!%p238_p2), %v4719_v18, 19  ;;  %vm655_vm4 = vcmp.lt.s32.totalorder (!%p238_p2), %v4719_v18, 17  ;;  %v4002_v37 = vld [vmem:[%s5457_s2 + $0x20] sm:$0xff] (!%p238_p2)  ;;  %vm841_vm5 = vcmp.lt.s32.totalorder (!%p238_p2), %v4719_v18, 1  ;;  %v4003_v46 = vld [vmem:[%s5457_s2 + $0x28] sm:$0xff] (!%p238_p2) }
   0xd   : > { %s5467_s25 = smov (!%p269_p3, %s3979_s25), 1  ;;  %v4011_v48 = vld [vmem:[%s5457_s2 + $0x30] sm:$0xff]  ;;  %v4012_v51 = vld [vmem:[%s5457_s2 + $0x38] sm:$0xff]  ;;  %vm1203_vm6 = vcmp.lt.s32.totalorder %v4719_v18, 127  ;;  %v4020_v53 = vld [vmem:[%s5457_s2 + $0x40] sm:$0xff]  ;;  %vm1389_vm7 = vcmp.lt.s32.totalorder %v4719_v18, 111 }
   0xe   : > { %s4393_s28 = smul.u32 24, %s5467_s25  ;;  %v4021_v58 = vld [vmem:[%s5457_s2 + $0x48] sm:$0xff]  ;;  %v4029_v63 = vld [vmem:[%s5457_s2 + $0x50] sm:$0xff]  ;;  %vm1575_vm8 = vcmp.lt.s32.totalorder %v4719_v18, 110  ;;  %vm1761_vm9 = vcmp.lt.s32.totalorder %v4719_v18, 109  ;;  %vm2469_vm13 = vcmask 130048  }
   0xf   : > { %s4394_s22 = smul.u32 12, %s5467_s25 }
  0x10   : > { %s273_s8 = scalar_lea.vmem %s5455_s0, %s4393_s28 }
  0x11   : > { %v4631_v2 = vld [vmem:[%s273_s8 + $0x10] sm:$0x3f]  ;;  %v4633_v3 = vld [vmem:[%s273_s8] sm:$0x3f]  ;;  %v4639_v4 = vld [vmem:[%s273_s8 + $0x8] sm:$0x3f] }
  0x12   : > { %304 = vrot.lane.b32.xlu1 %v4631_v2, %s4558_s9  ;;  %300 = vrot.lane.b32.xlu0 %v4633_v3, %s4558_s9 }
  0x16   : > { %285 = vrot.lane.b32.xlu1 %v4633_v3, %s4559_s10  ;;  %302 = vrot.lane.b32.xlu0 %v4639_v4, %s4558_s9 }
  0x1a   : > { %289 = vrot.lane.b32.xlu1 %v4631_v2, %s4559_s10  ;;  %287 = vrot.lane.b32.xlu0 %v4639_v4, %s4559_s10 }
  0x1e   : > { %651 = vrot.lane.b32.xlu1 %v4639_v4, %s4560_s11  ;;  %649 = vrot.lane.b32.xlu0 %v4633_v3, %s4560_s11 }
  0x22   : > { %835 = vrot.lane.b32.xlu1 %v4633_v3, %s4561_s12  ;;  %653 = vrot.lane.b32.xlu0 %v4631_v2, %s4560_s11 }
  0x26   : > { %839 = vrot.lane.b32.xlu1 %v4631_v2, %s4561_s12  ;;  %837 = vrot.lane.b32.xlu0 %v4639_v4, %s4561_s12 }
  0x2a   : > { %1199 = vrot.lane.b32.xlu0 %v4639_v4, %s4562_s13  ;;  %1201 = vrot.lane.b32.xlu1 %v4631_v2, %s4562_s13 }
  0x2e   : > { %1197 = vrot.lane.b32.xlu0 %v4633_v3, %s4562_s13  ;;  %1385 = vrot.lane.b32.xlu1 %v4639_v4, %s4563_s14 }
  0x32   : > { %1383 = vrot.lane.b32.xlu1 %v4633_v3, %s4563_s14  ;;  %1387 = vrot.lane.b32.xlu0 %v4631_v2, %s4563_s14 }
  0x36   : > { %1571 = vrot.lane.b32.xlu0 %v4639_v4, %s4564_s15  ;;  %1573 = vrot.lane.b32.xlu1 %v4631_v2, %s4564_s15 }
  0x3a   : > { %1569 = vrot.lane.b32.xlu0 %v4633_v3, %s4564_s15  ;;  %1757 = vrot.lane.b32.xlu1 %v4639_v4, %s4565_s16 }
  0x3e   : > { %1755 = vrot.lane.b32.xlu1 %v4633_v3, %s4565_s16  ;;  %1759 = vrot.lane.b32.xlu0 %v4631_v2, %s4565_s16 }
  0x42   : > { %1947 = vperm.xlu1 %4416, %v1939_v5   ;;  %1942 = vperm.xlu0 %4415, %v1938_v6  }
  0x46   : > { %2037 = vperm.xlu1 %4416, %v2025_v8   ;;  %2078 = vperm.xlu0 %4415, %v4065_v9   ;;  %v4038_v8 = vld [vmem:[%s5457_s2 + $0x60] sm:$0xff] }
  0x4a   : > { %2121 = vperm.xlu1 %4416, %v4066_v10   ;;  %2164 = vperm.xlu0 %4415, %v4067_v11   ;;  %v4039_v11 = vld [vmem:[%s5457_s2 + $0x68] sm:$0xff] }
  0x4e   : > { %2198 = vperm.xlu1 %4416, %v4068_v12   ;;  %2327 = vperm.xlu0 %4415, %v4071_v13  }
  0x52   : > { %2241 = vperm.xlu1 %4416, %v4069_v14   ;;  %2370 = vperm.xlu0 %4415, %v4072_v15  }
  0x56   : > { %2284 = vperm.xlu1 %4416, %v4070_v16   ;;  %v4047_v16 = vld [vmem:[%s5457_s2 + $0x70] sm:$0xff] }
  0x84   : > { %v305_v19 = vpop.permute.xlu1 %304  ;;  %v301_v20 = vpop.permute.xlu0 %300 }
  0x85   : > { %v309_v26 = vsel %vm306_vm1, %v305_v19, %v301_v20 }
  0x88   : > { %v286_v21 = vpop.permute.xlu1 %285  ;;  %v303_v22 = vpop.permute.xlu0 %302 }
  0x89   : > { %v308_v23 = vsel %vm306_vm1, %v301_v20, %v303_v22  ;;  %v307_v24 = vsel %vm306_vm1, %v303_v22, %v305_v19  ;;  %v4048_v19 = vld [vmem:[%s5457_s2 + $0x78] sm:$0xff]  ;;  %v4057_v22 = vld [vmem:[%s5457_s2 + $0x88] sm:$0xff] }
  0x8a   : > { %3988 = vmatprep.subr.msk.mxu0 %vm317_vm2, %v308_v23  ;;  %4158 = vmatprep.subr.msk.mxu1 %vm317_vm2, %v307_v24 }
  0x8b   : > { %3989 = vmatpush1.msk.msra.mxu0 %vm317_vm2, %v309_v26  ;;  %4159 = vmatpush3.msk.msra.mxu1 %vm317_vm2, %v307_v24 }
  0x8c   : > { %v290_v28 = vpop.permute.xlu1 %289  ;;  %3990 = vmatmul.mubr.msk.f32.vlgmr.msra.gmra.mrb[0].mxu0 %vm310_vm0, %v4620_v0  ;;  %4161 = vmatmul.mubr.msk.f32.vlgmr.msra.gmra.mrb[0].mxu1 %vm310_vm0, %v3987_v25  ;;  %v288_v29 = vpop.permute.xlu0 %287 }
  0x8d   : > { %v296_v30 = vsel %vm293_vm3, %v290_v28, %v286_v21  ;;  %v294_v31 = vsel %vm293_vm3, %v288_v29, %v290_v28  ;;  %v295_v32 = vsel %vm293_vm3, %v286_v21, %v288_v29  ;;  %397 = vmatprep.mubr.f32.mxu0 %v5463_v1  ;;  %4165 = vmatprep.mubr.msk.f32.mxu1 %vm310_vm0, %v283_v27  ;;  %v4056_v21 = vld [vmem:[%s5457_s2 + $0x80] sm:$0xff] }
  0x8e   : > { %3995 = vmatprep.subr.msk.mxu0 %vm317_vm2, %v295_v32  ;;  %4163 = vmatprep.subr.msk.mxu1 %vm317_vm2, %v294_v31 }
  0x8f   : > { %3996 = vmatpush1.msk.msra.mxu0 %vm317_vm2, %v296_v30  ;;  %4164 = vmatpush3.msk.msra.mxu1 %vm317_vm2, %v294_v31 }
  0x90   : > { %v652_v33 = vpop.permute.xlu1 %651  ;;  %3991 = vmatmul.mubr.msk.f32.gmra.mrb[2].mxu0 %vm310_vm0, %v3987_v25  ;;  %v650_v34 = vpop.permute.xlu0 %649 }
  0x91   : > { %v657_v35 = vsel %vm655_vm4, %v650_v34, %v652_v33  ;;  %558 = vmatprep.mubr.f32.mxu0 %v5463_v1 }
  0x92   : > { %4004 = vmatprep.subr.msk.mxu0 %vm317_vm2, %v657_v35 }
  0x94   : > { %v836_v38 = vpop.permute.xlu1 %835  ;;  %3997 = vmatmul.mubr.msk.f32.vlgmr.msra.gmra.mrb[0].mxu0 %vm310_vm0, %v283_v27  ;;  %4166 = vmatmul.mubr.msk.f32.vlgmr.msra.gmra.mrb[0].mxu1 %vm310_vm0, %v284_v36  ;;  %v654_v39 = vpop.permute.xlu0 %653 }
  0x95   : > { %v656_v40 = vsel %vm655_vm4, %v652_v33, %v654_v39  ;;  %v658_v41 = vsel %vm655_vm4, %v654_v39, %v650_v34  ;;  %564 = vmatprep.mubr.f32.mxu0 %v5463_v1  ;;  %4170 = vmatprep.mubr.msk.f32.mxu1 %vm310_vm0, %v4002_v37 }
  0x96   : > { %4005 = vmatpush1.msk.msra.mxu0 %vm317_vm2, %v658_v41  ;;  %4168 = vmatprep.subr.msk.mxu1 %vm317_vm2, %v656_v40 }
  0x97   : > { %4169 = vmatpush3.msk.msra.mxu1 %vm317_vm2, %v656_v40 }
  0x98   : > { %v840_v42 = vpop.permute.xlu1 %839  ;;  %3998 = vmatmul.mubr.msk.f32.gmra.mrb[2].mxu0 %vm310_vm0, %v284_v36  ;;  %v838_v43 = vpop.permute.xlu0 %837 }
  0x99   : > { %v842_v44 = vsel %vm841_vm5, %v838_v43, %v840_v42  ;;  %v843_v45 = vsel %vm841_vm5, %v836_v38, %v838_v43  ;;  %738 = vmatprep.mubr.f32.mxu0 %v5463_v1  ;;  %v844_v47 = vsel %vm841_vm5, %v840_v42, %v836_v38 }
  0x9a   : > { %4013 = vmatprep.subr.msk.mxu0 %vm317_vm2, %v843_v45  ;;  %4173 = vmatprep.subr.msk.mxu1 %vm317_vm2, %v842_v44  ;;  %v2008_v45 = vshrl.u32 %v291_v17, 7 }
  0x9c   : > { %4006 = vmatmul.mubr.msk.f32.vlgmr.msra.gmra.mrb[0].mxu0 %vm310_vm0, %v4002_v37  ;;  %4171 = vmatmul.mubr.msk.f32.vlgmr.msra.gmra.mrb[0].mxu1 %vm310_vm0, %v4003_v46  ;;  %v1200_v49 = vpop.permute.xlu0 %1199  ;;  %v1202_v50 = vpop.permute.xlu1 %1201 }
  0x9d   : > { %4014 = vmatpush1.msk.msra.mxu0 %vm317_vm2, %v844_v47  ;;  %4174 = vmatpush3.msk.msra.mxu1 %vm317_vm2, %v842_v44  ;;  %v1204_v54 = vsel %vm1203_vm6, %v1200_v49, %v1202_v50 }
  0x9e   : > { %744 = vmatprep.mubr.f32.mxu0 %v5463_v1  ;;  %4175 = vmatprep.mubr.msk.f32.mxu1 %vm310_vm0, %v4011_v48 }
  0x9f   : > { %4178 = vmatprep.subr.msk.mxu1 %vm317_vm2, %v4631_v2  ;;  %4022 = vmatprep.subr.msk.mxu0 %vm317_vm2, %v4639_v4 }
  0xa0   : > { %4007 = vmatmul.mubr.msk.f32.gmra.mrb[2].mxu0 %vm310_vm0, %v4003_v46  ;;  %v1198_v52 = vpop.permute.xlu0 %1197  ;;  %v1386_v56 = vpop.permute.xlu1 %1385 }
  0xa1   : > { %924 = vmatprep.mubr.f32.mxu0 %v5463_v1  ;;  %v1206_v55 = vsel %vm1203_vm6, %v1202_v50, %v1198_v52  ;;  %v1205_v59 = vsel %vm1203_vm6, %v1198_v52, %v1200_v49 }
  0xa4   : > { %4015 = vmatmul.mubr.msk.f32.vlgmr.msra.gmra.mrb[0].mxu0 %vm310_vm0, %v4011_v48  ;;  %4176 = vmatmul.mubr.msk.f32.vlgmr.msra.gmra.mrb[0].mxu1 %vm310_vm0, %v4012_v51  ;;  %v1388_v57 = vpop.permute.xlu0 %1387  ;;  %v1384_v60 = vpop.permute.xlu1 %1383 }
  0xa5   : > { %930 = vmatprep.mubr.f32.mxu0 %v5463_v1  ;;  %4179 = vmatpush3.msk.msra.mxu1 %vm317_vm2, %v4631_v2  ;;  %v1390_v61 = vsel %vm1389_vm7, %v1386_v56, %v1388_v57  ;;  %v1392_v62 = vsel %vm1389_vm7, %v1388_v57, %v1384_v60  ;;  %v1391_v4 = vsel %vm1389_vm7, %v1384_v60, %v1386_v56  ;;  %v282_v57 = vld [vmem:[%s5456_s1] sm:$0x7] }
  0xa6   : > { %4023 = vmatpush1.msk.msra.mxu0 %vm317_vm2, %v4633_v3  ;;  %4180 = vmatprep.mubr.msk.f32.mxu1 %vm310_vm0, %v4020_v53  ;;  %v4030_v3 = vld [vmem:[%s5457_s2 + $0x58] sm:$0xff] }
  0xa7   : > { %4031 = vmatprep.subr.msk.mxu0 %vm317_vm2, %v1204_v54  ;;  %4183 = vmatprep.subr.msk.mxu1 %vm317_vm2, %v1206_v55 }
  0xa8   : > { %4016 = vmatmul.mubr.msk.f32.gmra.mrb[2].mxu0 %vm310_vm0, %v4012_v51  ;;  %v1572_v0 = vpop.permute.xlu0 %1571  ;;  %v1574_v2 = vpop.permute.xlu1 %1573 }
  0xa9   : > { %1100 = vmatprep.mubr.f32.mxu0 %v5463_v1  ;;  %v1576_v5 = vsel %vm1575_vm8, %v1572_v0, %v1574_v2 }
  0xac   : > { %4024 = vmatmul.mubr.msk.f32.vlgmr.msra.gmra.mrb[0].mxu0 %vm310_vm0, %v4020_v53  ;;  %4181 = vmatmul.mubr.msk.f32.vlgmr.msra.gmra.mrb[0].mxu1 %vm310_vm0, %v4021_v58  ;;  %v1570_v6 = vpop.permute.xlu0 %1569  ;;  %v1758_v9 = vpop.permute.xlu1 %1757 }
  0xad   : > { %4032 = vmatpush1.msk.msra.mxu0 %vm317_vm2, %v1205_v59  ;;  %4184 = vmatpush3.msk.msra.mxu1 %vm317_vm2, %v1206_v55  ;;  %v1578_v7 = vsel %vm1575_vm8, %v1574_v2, %v1570_v6  ;;  %v1577_v12 = vsel %vm1575_vm8, %v1570_v6, %v1572_v0  ;;  %v2017_v55 = vsub.s32 2, %v2008_v45 }
  0xae   : > { %1106 = vmatprep.mubr.f32.mxu0 %v5463_v1  ;;  %4040 = vmatprep.subr.msk.mxu0 %vm317_vm2, %v1390_v61 }
  0xaf   : > { %4185 = vmatprep.mubr.msk.f32.mxu1 %vm310_vm0, %v4029_v63  ;;  %4188 = vmatprep.subr.msk.mxu1 %vm317_vm2, %v1392_v62  ;;  %v4950_v0 = vrot.slane %v282_v57, %v2017_v55 }
  0xb0   : > { %4025 = vmatmul.mubr.msk.f32.gmra.mrb[2].mxu0 %vm310_vm0, %v4021_v58  ;;  %v1760_v10 = vpop.permute.xlu0 %1759  ;;  %v1756_v13 = vpop.permute.xlu1 %1755 }
  0xb1   : > { %1286 = vmatprep.mubr.f32.mxu0 %v5463_v1  ;;  %v1762_v14 = vsel %vm1761_vm9, %v1758_v9, %v1760_v10  ;;  %v1764_v15 = vsel %vm1761_vm9, %v1760_v10, %v1756_v13  ;;  %v1763_v20 = vsel %vm1761_vm9, %v1756_v13, %v1758_v9 }
  0xb4   : > { %4033 = vmatmul.mubr.msk.f32.vlgmr.msra.gmra.mrb[0].mxu0 %vm310_vm0, %v4029_v63  ;;  %4186 = vmatmul.mubr.msk.f32.vlgmr.msra.gmra.mrb[0].mxu1 %vm310_vm0, %v4030_v3 }
  0xb5   : > { %4041 = vmatpush1.msk.msra.mxu0 %vm317_vm2, %v1391_v4  ;;  %4189 = vmatpush3.msk.msra.mxu1 %vm317_vm2, %v1392_v62 }
  0xb6   : > { %1292 = vmatprep.mubr.f32.mxu0 %v5463_v1  ;;  %4049 = vmatprep.subr.msk.mxu0 %vm317_vm2, %v1576_v5 }
  0xb7   : > { %4190 = vmatprep.mubr.msk.f32.mxu1 %vm310_vm0, %v4038_v8  ;;  %4193 = vmatprep.subr.msk.mxu1 %vm317_vm2, %v1578_v7 }
  0xb8   : > { %4034 = vmatmul.mubr.msk.f32.gmra.mrb[2].mxu0 %vm310_vm0, %v4030_v3 }
  0xb9   : > { %1472 = vmatprep.mubr.f32.mxu0 %v5463_v1 }
  0xbc   : > { %4042 = vmatmul.mubr.msk.f32.vlgmr.msra.gmra.mrb[0].mxu0 %vm310_vm0, %v4038_v8  ;;  %4191 = vmatmul.mubr.msk.f32.vlgmr.msra.gmra.mrb[0].mxu1 %vm310_vm0, %v4039_v11 }
  0xbd   : > { %4050 = vmatpush1.msk.msra.mxu0 %vm317_vm2, %v1577_v12  ;;  %4194 = vmatpush3.msk.msra.mxu1 %vm317_vm2, %v1578_v7 }
  0xbe   : > { %1478 = vmatprep.mubr.f32.mxu0 %v5463_v1  ;;  %4058 = vmatprep.subr.msk.mxu0 %vm317_vm2, %v1762_v14  ;;  %v2009_v14 = vsub.s32 0, %v2008_v45 }
  0xbf   : > { %4195 = vmatprep.mubr.msk.f32.mxu1 %vm310_vm0, %v4047_v16  ;;  %4198 = vmatprep.subr.msk.mxu1 %vm317_vm2, %v1764_v15 }
  0xc0   : > { %4043 = vmatmul.mubr.msk.f32.gmra.mrb[2].mxu0 %vm310_vm0, %v4039_v11 }
  0xc1   : > { %1658 = vmatprep.mubr.f32.mxu0 %v5463_v1  ;;  %v1948_v23 = vpop.permute.xlu1 %1947  ;;  %v1943_v24 = vpop.permute.xlu0 %1942 }
  0xc4   : > { %4051 = vmatmul.mubr.msk.f32.vlgmr.msra.gmra.mrb[0].mxu0 %vm310_vm0, %v4047_v16  ;;  %4196 = vmatmul.mubr.msk.f32.vlgmr.msra.gmra.mrb[0].mxu1 %vm310_vm0, %v4048_v19 }
  0xc5   : > { %4059 = vmatpush1.msk.msra.mxu0 %vm317_vm2, %v1763_v20  ;;  %4199 = vmatpush3.msk.msra.mxu1 %vm317_vm2, %v1764_v15 }
  0xc6   : > { %1664 = vmatprep.mubr.f32.mxu0 %v5463_v1  ;;  %4200 = vmatprep.mubr.msk.f32.mxu1 %vm310_vm0, %v4056_v21 }
  0xc8   : > { %4052 = vmatmul.mubr.msk.f32.gmra.mrb[2].mxu0 %vm310_vm0, %v4048_v19 }
  0xc9   : > { %1844 = vmatprep.mubr.f32.mxu0 %v5463_v1 }
  0xcc   : > { %4060 = vmatmul.mubr.msk.f32.vlgmr.msra.gmra.mrb[0].mxu0 %vm310_vm0, %v4056_v21  ;;  %4201 = vmatmul.mubr.msk.f32.vlgmr.msra.gmra.mrb[0].mxu1 %vm310_vm0, %v4057_v22  ;;  %v4958_v21 = vrot.slane %v282_v57, %v2009_v14 }
  0xcd   : > { %1850 = vmatprep.mubr.f32.mxu0 %v5463_v1  ;;  %2537 = vmatprep.mubr.f32.mxu1 %v5463_v1 }
  0xd0   : > { %4061 = vmatmul.mubr.msk.f32.gmra.mrb[2].mxu0 %vm310_vm0, %v4057_v22 }
 0x19f   : > { %v1846_v25 = vpop.f32.mrb[0].mxu0  ;;  %v4202_v26 = vpop.f32.mrb[0].mxu1 }
 0x1a0   : > { %v4922_v27 = vadd.f32 %v4202_v26, %v1948_v23  ;;  %v1848_v28 = vpop.f32.mrb[1].mxu0  ;;  %v1923_v29 = vpop.f32.mrb[1].mxu1  ;;  %v4930_v34 = vadd.f32 %v1943_v24, %v1846_v25 }
 0x1a1   : > { %v4924_v30 = vadd.f32 %v1943_v24, %v1923_v29  ;;  %v4940_v42 = vadd.f32 %v1943_v24, %v1848_v28  ;;  %v2013_v29 = vsub.s32 1, %v2008_v45  ;;  %v4567_v45 = vmov 0.0|0.0  }
 0x1a2   : > { %4298 = vmatprep.subr.bf16.mxu0 %v4567_v45 }
 0x1a3   : > { %v1970_v31 = vadd.f32 %v4922_v27, %v4924_v30  ;;  %v1995_v32 = vmax.f32 %v4924_v30, %v4922_v27  ;;  %v1852_v33 = vpop.f32.mrb[2].mxu0 }
 0x1a4   : > { %v4932_v35 = vadd.f32 %v1948_v23, %v1852_v33  ;;  %v1854_v36 = vpop.f32.mrb[3].mxu0  ;;  %v4968_v33 = vrot.slane %v282_v57, %v2013_v29 }
 0x1a5   : > { %v1971_v37 = vrot.slane %v1970_v31, 4  ;;  %v1996_v38 = vrot.slane %v1995_v32, 4  ;;  %v4934_v39 = vadd.f32 %v1948_v23, %v1854_v36 }
 0x1a6   : > { %v1956_v40 = vadd.f32 %v4932_v35, %v4930_v34  ;;  %v1981_v41 = vmax.f32 %v4930_v34, %v4932_v35 }
 0x1a7   : > { %v1972_v43 = vadd.f32 %v1971_v37, %v1970_v31  ;;  %v1997_v44 = vmax.f32 %v1995_v32, %v1996_v38  ;;  %v1963_v50 = vadd.f32 %v4934_v39, %v4940_v42  ;;  %v1988_v63 = vmax.f32 %v4940_v42, %v4934_v39  ;;  %v4986_v38 = vpop.permute.xlu1 %2037 }
 0x1a8   : > { %v1957_v46 = vrot.slane %v1956_v40, 4  ;;  %v1982_v47 = vrot.slane %v1981_v41, 4 }
 0x1a9   : > { %v1973_v48 = vrot.slane %v1972_v43, 2  ;;  %v1998_v49 = vrot.slane %v1997_v44, 2  ;;  %v1964_v17 = vrot.slane %v1963_v50, 4  ;;  %v1989_v8 = vrot.slane %v1988_v63, 4 }
 0x1aa   : > { %v1958_v51 = vadd.f32 %v1957_v46, %v1956_v40  ;;  %v1983_v54 = vmax.f32 %v1981_v41, %v1982_v47  ;;  %v4990_v41 = vpop.permute.xlu0 %2078 }
 0x1ab   : > { %v1974_v52 = vadd.f32 %v1973_v48, %v1972_v43  ;;  %v1999_v53 = vmax.f32 %v1997_v44, %v1998_v49  ;;  %v1965_v5 = vadd.f32 %v1964_v17, %v1963_v50  ;;  %v1990_v13 = vmax.f32 %v1988_v63, %v1989_v8  ;;  %v4988_v40 = vpop.permute.xlu1 %2121 }
 0x1ac   : > { %v1959_v56 = vrot.slane %v1958_v51, 2  ;;  %v1984_v62 = vrot.slane %v1983_v54, 2 }
 0x1ad   : > { %v1975_v58 = vrot.slane %v1974_v52, 1  ;;  %v2000_v59 = vrot.slane %v1999_v53, 1  ;;  %v1966_v11 = vrot.slane %v1965_v5, 2  ;;  %v1991_v20 = vrot.slane %v1990_v13, 2 }
 0x1ae   : > { %v1960_v60 = vadd.f32 %v1959_v56, %v1958_v51  ;;  %v1985_v7 = vmax.f32 %v1983_v54, %v1984_v62  ;;  %v4992_v44 = vpop.permute.xlu0 %2164 }
 0x1af   : > { %v1976_v61 = vadd.f32 %v1975_v58, %v1974_v52  ;;  %v2001_v3 = vmax.f32 %v1999_v53, %v2000_v59  ;;  %v1967_v16 = vadd.f32 %v1966_v11, %v1965_v5  ;;  %v1992_v24 = vmax.f32 %v1990_v13, %v1991_v20  ;;  %v2199_v43 = vpop.permute.xlu1 %2198 }
 0x1b0   : > { %v1961_v4 = vrot.slane %v1960_v60, 1  ;;  %v1986_v12 = vrot.slane %v1985_v7, 1 }
 0x1b1   : > { %v1980_v2 = vmul.f32 0.0625, %v1976_v61  ;;  %v1968_v23 = vrot.slane %v1967_v16, 1  ;;  %v1993_v28 = vrot.slane %v1992_v24, 1 }
 0x1b2   : > { %v1962_v10 = vadd.f32 %v1961_v4, %v1960_v60  ;;  %v1987_v19 = vmax.f32 %v1985_v7, %v1986_v12  ;;  %v4997_v47 = vpop.permute.xlu0 %2327 }
 0x1b3   : > { %v2005_v6 = vsel %vm2002_vm10, %v1980_v2, %v2001_v3  ;;  %v1969_v26 = vadd.f32 %v1968_v23, %v1967_v16  ;;  %v1994_v32 = vmax.f32 %v1992_v24, %v1993_v28  ;;  %v4995_v46 = vpop.permute.xlu1 %2241 }
 0x1b4   : > { %v2024_v9 = vmul.f32 %v4950_v0, %v2005_v6  ;;  %v1978_v15 = vmul.f32 0.0625, %v1962_v10 }
 0x1b5   : > { %v1979_v31 = vmul.f32 0.0625, %v1969_v26 }
 0x1b6   : > { %2071 = vrot.lane.b32.xlu0 %v2024_v9, %s4558_s9  ;;  %2030 = vrot.lane.b32.xlu1 %v2024_v9, %s4559_s10  ;;  %v2003_v22 = vsel %vm2002_vm10, %v1978_v15, %v1987_v19  ;;  %v5001_v49 = vpop.permute.xlu0 %2370  ;;  %v2203_v52 = vmul.f32 %v2199_v43, %v2024_v9 }
 0x1b7   : > { %v2022_v25 = vmul.f32 %v4958_v21, %v2003_v22  ;;  %v2004_v36 = vsel %vm2002_vm10, %v1979_v31, %v1994_v32  ;;  %v4999_v48 = vpop.permute.xlu1 %2284 }
 0x1b8   : > { %v2023_v37 = vmul.f32 %v4968_v33, %v2004_v36  ;;  %v2218_v55 = vsel %vm2043_vm11, %v2203_v52, 0.0 }
 0x1b9   : > { %v2219_v58 = vrot.slane %v2218_v55, 4  ;;  %v2201_v59 = vmul.f32 %v2199_v43, %v2022_v25 }
 0x1ba   : > { %2114 = vrot.lane.b32.xlu0 %v2024_v9, %s4560_s11  ;;  %2234 = vrot.lane.b32.xlu1 %v2024_v9, %s4562_s13  ;;  %v2202_v62 = vmul.f32 %v2199_v43, %v2023_v37 }
 0x1bb   : > { %v2220_v61 = vadd.f32 %v2219_v58, %v2218_v55  ;;  %v2204_v63 = vsel %vm2043_vm11, %v2201_v59, 0.0 }
 0x1bc   : > { %v2205_v6 = vrot.slane %v2204_v63, 4  ;;  %v2211_v12 = vsel %vm2043_vm11, %v2202_v62, 0.0 }
 0x1bd   : > { %v2221_v11 = vrot.slane %v2220_v61, 2 }
 0x1be   : > { %2157 = vrot.lane.b32.xlu0 %v2024_v9, %s4561_s12  ;;  %2277 = vrot.lane.b32.xlu1 %v2024_v9, %s4563_s14  ;;  %v2206_v24 = vadd.f32 %v2205_v6, %v2204_v63 }
 0x1bf   : > { %v2222_v43 = vadd.f32 %v2221_v11, %v2220_v61 }
 0x1c0   : > { %v2207_v59 = vrot.slane %v2206_v24, 2 }
 0x1c1   : > { %v2223_v6 = vrot.slane %v2222_v43, 1 }
 0x1c2   : > { %2067 = vrot.lane.b32.xlu0 %v2022_v25, %s4558_s9  ;;  %2026 = vrot.lane.b32.xlu1 %v2022_v25, %s4559_s10 }
 0x1c6   : > { %2110 = vrot.lane.b32.xlu0 %v2022_v25, %s4560_s11  ;;  %2230 = vrot.lane.b32.xlu1 %v2022_v25, %s4562_s13 }
 0x1ca   : > { %2153 = vrot.lane.b32.xlu0 %v2022_v25, %s4561_s12  ;;  %2273 = vrot.lane.b32.xlu1 %v2022_v25, %s4563_s14 }
 0x1ce   : > { %2316 = vrot.lane.b32.xlu0 %v2022_v25, %s4564_s15  ;;  %2069 = vrot.lane.b32.xlu1 %v2023_v37, %s4558_s9 }
 0x1d2   : > { %2028 = vrot.lane.b32.xlu0 %v2023_v37, %s4559_s10  ;;  %2112 = vrot.lane.b32.xlu1 %v2023_v37, %s4560_s11 }
 0x1d6   : > { %2320 = vrot.lane.b32.xlu0 %v2024_v9, %s4564_s15  ;;  %2155 = vrot.lane.b32.xlu1 %v2023_v37, %s4561_s12 }
 0x1da   : > { %2232 = vrot.lane.b32.xlu0 %v2023_v37, %s4562_s13  ;;  %2359 = vrot.lane.b32.xlu1 %v2022_v25, %s4565_s16  ;;  %v2212_v25 = vrot.slane %v2211_v12, 4 }
 0x1dc   : > { %v2213_v62 = vadd.f32 %v2212_v25, %v2211_v12 }
 0x1de   : > { %2275 = vrot.lane.b32.xlu0 %v2023_v37, %s4563_s14  ;;  %2318 = vrot.lane.b32.xlu1 %v2023_v37, %s4564_s15 }
 0x1e2   : > { %2361 = vrot.lane.b32.xlu0 %v2023_v37, %s4565_s16  ;;  %2363 = vrot.lane.b32.xlu1 %v2024_v9, %s4565_s16 }
 0x228   : > { %v5003_v50 = vpop.permute.xlu1 %2030  ;;  %v2072_v51 = vpop.permute.xlu0 %2071 }
 0x22c   : > { %v5005_v53 = vpop.permute.xlu1 %2234  ;;  %v5007_v54 = vpop.permute.xlu0 %2114 }
 0x230   : > { %v5010_v56 = vpop.permute.xlu1 %2277  ;;  %v5012_v57 = vpop.permute.xlu0 %2157 }
 0x234   : > { %v5014_v17 = vpop.permute.xlu1 %2026  ;;  %v2068_v60 = vpop.permute.xlu0 %2067 }
 0x235   : > { %v2034_v2 = vsel %vm293_vm3, %v5003_v50, %v5014_v17  ;;  %v2075_v3 = vsel %vm306_vm1, %v2072_v51, %v2068_v60 }
 0x236   : > { %v2040_v4 = vmul.f32 %v4986_v38, %v2034_v2  ;;  %v2081_v5 = vmul.f32 %v4990_v41, %v2075_v3 }
 0x238   : > { %v2044_v7 = vsel %vm2043_vm11, %v2040_v4, 0.0  ;;  %v2084_v8 = vsel %vm2043_vm11, %v2081_v5, 0.0  ;;  %v5027_v9 = vpop.permute.xlu1 %2230  ;;  %v2111_v10 = vpop.permute.xlu0 %2110 }
 0x239   : > { %v2045_v13 = vrot.slane %v2044_v7, 4  ;;  %v2085_v14 = vrot.slane %v2084_v8, 4  ;;  %v2238_v15 = vsel %vm1203_vm6, %v5005_v53, %v5027_v9  ;;  %v2118_v16 = vsel %vm655_vm4, %v5007_v54, %v2111_v10 }
 0x23a   : > { %v2246_v19 = vmul.f32 %v4995_v46, %v2238_v15  ;;  %v2124_v20 = vmul.f32 %v4988_v40, %v2118_v16  ;;  %v2208_v15 = vadd.f32 %v2207_v59, %v2206_v24  ;;  %v2214_v16 = vrot.slane %v2213_v62, 2 }
 0x23b   : > { %v2046_v22 = vadd.f32 %v2045_v13, %v2044_v7  ;;  %v2086_v23 = vadd.f32 %v2085_v14, %v2084_v8 }
 0x23c   : > { %v2261_v26 = vsel %vm2043_vm11, %v2246_v19, 0.0  ;;  %v2127_v28 = vsel %vm2043_vm11, %v2124_v20, 0.0  ;;  %v5041_v29 = vpop.permute.xlu1 %2273  ;;  %v5043_v31 = vpop.permute.xlu0 %2153  ;;  %v5072_v59 = vadd.f32 %v2214_v16, %v2213_v62 }
 0x23d   : > { %v2047_v32 = vrot.slane %v2046_v22, 2  ;;  %v2087_v36 = vrot.slane %v2086_v23, 2  ;;  %v2128_v37 = vrot.slane %v2127_v28, 4  ;;  %v2281_v52 = vsel %vm1389_vm7, %v5010_v56, %v5041_v29 }
 0x23e   : > { %v2161_v55 = vsel %vm841_vm5, %v5012_v57, %v5043_v31  ;;  %v2262_v58 = vrot.slane %v2261_v26, 4  ;;  %v2289_v2 = vmul.f32 %v4999_v48, %v2281_v52 }
 0x23f   : > { %v2129_v63 = vadd.f32 %v2128_v37, %v2127_v28  ;;  %v2167_v3 = vmul.f32 %v4992_v44, %v2161_v55  ;;  %v2048_v61 = vadd.f32 %v2047_v32, %v2046_v22  ;;  %v2088_v5 = vadd.f32 %v2087_v36, %v2086_v23 }
 0x240   : > { %v2070_v4 = vpop.permute.xlu1 %2069  ;;  %v2304_v7 = vsel %vm2043_vm11, %v2289_v2, 0.0  ;;  %v5061_v12 = vpop.permute.xlu0 %2316  ;;  %v2263_v14 = vadd.f32 %v2262_v58, %v2261_v26  ;;  %v5068_v36 = vadd.f32 %v2223_v6, %v2222_v43  ;;  %v2209_v58 = vrot.slane %v2208_v15, 1 }
 0x241   : > { %v2170_v8 = vsel %vm2043_vm11, %v2167_v3, 0.0  ;;  %v2073_v11 = vsel %vm306_vm1, %v2070_v4, %v2072_v51  ;;  %v2074_v13 = vsel %vm306_vm1, %v2068_v60, %v2070_v4  ;;  %v2130_v19 = vrot.slane %v2129_v63, 2 }
 0x242   : > { %v2171_v20 = vrot.slane %v2170_v8, 4  ;;  %v2082_v22 = vmul.f32 %v4990_v41, %v2074_v13  ;;  %v2083_v23 = vmul.f32 %v4990_v41, %v2073_v11  ;;  %v2049_v28 = vrot.slane %v2048_v61, 1 }
 0x243   : > { %v2305_v32 = vrot.slane %v2304_v7, 4  ;;  %v2089_v60 = vrot.slane %v2088_v5, 1  ;;  %v2264_v41 = vrot.slane %v2263_v14, 2  ;;  %v2131_v2 = vadd.f32 %v2130_v19, %v2129_v63 }
 0x244   : > { %v2113_v25 = vpop.permute.xlu1 %2112  ;;  %v2172_v37 = vadd.f32 %v2171_v20, %v2170_v8  ;;  %v2091_v24 = vsel %vm2043_vm11, %v2082_v22, 0.0  ;;  %v2098_v26 = vsel %vm2043_vm11, %v2083_v23, 0.0  ;;  %v2029_v43 = vpop.permute.xlu0 %2028  ;;  %v2050_v13 = vadd.f32 %v2049_v28, %v2048_v61 }
 0x245   : > { %v2116_v51 = vsel %vm655_vm4, %v2113_v25, %v5007_v54  ;;  %v2092_v52 = vrot.slane %v2091_v24, 4  ;;  %v2099_v55 = vrot.slane %v2098_v26, 4  ;;  %v2117_v3 = vsel %vm655_vm4, %v2111_v10, %v2113_v25 }
 0x246   : > { %v2126_v54 = vmul.f32 %v4988_v40, %v2116_v51  ;;  %v2306_v4 = vadd.f32 %v2305_v32, %v2304_v7  ;;  %v2125_v11 = vmul.f32 %v4988_v40, %v2117_v3  ;;  %v2090_v20 = vadd.f32 %v2089_v60, %v2088_v5 }
 0x247   : > { %v2093_v6 = vadd.f32 %v2092_v52, %v2091_v24  ;;  %v2100_v8 = vadd.f32 %v2099_v55, %v2098_v26  ;;  %v2173_v22 = vrot.slane %v2172_v37, 2  ;;  %v2032_v10 = vsel %vm293_vm3, %v2029_v43, %v5003_v50 }
 0x248   : > { %v2141_v23 = vsel %vm2043_vm11, %v2126_v54, 0.0  ;;  %v2134_v16 = vsel %vm2043_vm11, %v2125_v11, 0.0  ;;  %v2156_v19 = vpop.permute.xlu1 %2155  ;;  %v2132_v25 = vrot.slane %v2131_v2, 1  ;;  %v2033_v40 = vsel %vm293_vm3, %v5014_v17, %v2029_v43  ;;  %v2321_v26 = vpop.permute.xlu0 %2320 }
 0x249   : > { %v2101_v62 = vrot.slane %v2100_v8, 2  ;;  %v2142_v63 = vrot.slane %v2141_v23, 4  ;;  %v2094_v7 = vrot.slane %v2093_v6, 2  ;;  %v2135_v32 = vrot.slane %v2134_v16, 4 }
 0x24a   : > { %v2307_v61 = vrot.slane %v2306_v4, 2  ;;  %v2041_v51 = vmul.f32 %v4986_v38, %v2033_v40  ;;  %v2042_v24 = vmul.f32 %v4986_v38, %v2032_v10  ;;  %v5088_v52 = vadd.f32 %v2209_v58, %v2208_v15 }
 0x24b   : > { %v2102_v5 = vadd.f32 %v2101_v62, %v2100_v8  ;;  %v2143_v28 = vadd.f32 %v2142_v63, %v2141_v23  ;;  %v2136_v60 = vadd.f32 %v2135_v32, %v2134_v16  ;;  %v2216_v50 = vrot.slane %v5072_v59, 1 }
 0x24c   : > { %v5091_v55 = vadd.f32 %v2090_v20, %v2050_v13  ;;  %v5093_v3 = vadd.f32 %v2264_v41, %v2263_v14  ;;  %v5095_v54 = vadd.f32 %v2173_v22, %v2172_v37  ;;  %v2051_v17 = vsel %vm2043_vm11, %v2041_v51, 0.0  ;;  %v5103_v16 = vpop.permute.xlu1 %2359 }
 0x24d   : > { %v2095_v43 = vadd.f32 %v2094_v7, %v2093_v6  ;;  %v2103_v8 = vrot.slane %v2102_v5, 1  ;;  %v2052_v11 = vrot.slane %v2051_v17, 4  ;;  %v2058_v23 = vsel %vm2043_vm11, %v2042_v24, 0.0  ;;  %v2233_v7 = vpop.permute.xlu0 %2232 }
 0x24e   : > { %v5099_v62 = vadd.f32 %v2132_v25, %v2131_v2  ;;  %v5101_v38 = vadd.f32 %v2307_v61, %v2306_v4  ;;  %v2144_v15 = vrot.slane %v2143_v28, 2  ;;  %v2059_v58 = vrot.slane %v2058_v23, 4 }
 0x24f   : > { %v2137_v13 = vrot.slane %v2136_v60, 2  ;;  %v2053_v14 = vadd.f32 %v2052_v11, %v2051_v17  ;;  %v2159_v37 = vsel %vm841_vm5, %v2156_v19, %v5012_v57  ;;  %v2160_v41 = vsel %vm841_vm5, %v5043_v31, %v2156_v19 }
 0x250   : > { %v2175_v6 = vrot.slane %v5095_v54, 1  ;;  %v2060_v2 = vadd.f32 %v2059_v58, %v2058_v23  ;;  %v2168_v4 = vmul.f32 %v4992_v44, %v2160_v41  ;;  %v2169_v20 = vmul.f32 %v4992_v44, %v2159_v37 }
 0x251   : > { %v2096_v22 = vrot.slane %v2095_v43, 1  ;;  %v2104_v63 = vadd.f32 %v2103_v8, %v2102_v5  ;;  %v2054_v10 = vrot.slane %v2053_v14, 2  ;;  %v2324_v25 = vsel %vm1575_vm8, %v2321_v26, %v5061_v12  ;;  %v2319_v8 = vpop.permute.xlu1 %2318 }
 0x252   : > { %v2145_v57 = vadd.f32 %v2144_v15, %v2143_v28  ;;  %v2061_v32 = vrot.slane %v2060_v2, 2  ;;  %v2177_v40 = vsel %vm2043_vm11, %v2168_v4, 0.0  ;;  %v2184_v31 = vsel %vm2043_vm11, %v2169_v20, 0.0 }
 0x253   : > { %v2138_v19 = vadd.f32 %v2137_v13, %v2136_v60  ;;  %v2055_v61 = vadd.f32 %v2054_v10, %v2053_v14  ;;  %v2178_v51 = vrot.slane %v2177_v40, 4  ;;  %v2185_v24 = vrot.slane %v2184_v31, 4 }
 0x254   : > { %v2062_v17 = vadd.f32 %v2061_v32, %v2060_v2  ;;  %v2332_v44 = vmul.f32 %v4997_v47, %v2324_v25  ;;  %v2236_v5 = vsel %vm1203_vm6, %v2233_v7, %v5005_v53  ;;  %v2237_v28 = vsel %vm1203_vm6, %v5027_v9, %v2233_v7 }
 0x255   : > { %v2056_v11 = vrot.slane %v2055_v61, 1  ;;  %v2179_v23 = vadd.f32 %v2178_v51, %v2177_v40  ;;  %v2186_v15 = vadd.f32 %v2185_v24, %v2184_v31  ;;  %v2244_v60 = vmul.f32 %v4995_v46, %v2237_v28 }
 0x256   : > { %v2146_v58 = vrot.slane %v2145_v57, 1  ;;  %v2063_v13 = vrot.slane %v2062_v17, 1  ;;  %v2347_v14 = vsel %vm2043_vm11, %v2332_v44, 0.0  ;;  %v2245_v37 = vmul.f32 %v4995_v46, %v2236_v5 }
 0x257   : > { %v2180_v41 = vrot.slane %v2179_v23, 2  ;;  %v2187_v2 = vrot.slane %v2186_v15, 2  ;;  %v2348_v4 = vrot.slane %v2347_v14, 4  ;;  %v2322_v53 = vsel %vm1575_vm8, %v2319_v8, %v2321_v26 }
 0x258   : > { %v2064_v20 = vadd.f32 %v2063_v13, %v2062_v17  ;;  %v2247_v9 = vsel %vm2043_vm11, %v2244_v60, 0.0  ;;  %v2254_v10 = vsel %vm2043_vm11, %v2245_v37, 0.0  ;;  %v2323_v25 = vsel %vm1575_vm8, %v5061_v12, %v2319_v8 }
 0x259   : > { %v2057_v7 = vadd.f32 %v2056_v11, %v2055_v61  ;;  %v2181_v32 = vadd.f32 %v2180_v41, %v2179_v23  ;;  %v2188_v40 = vadd.f32 %v2187_v2, %v2186_v15  ;;  %v2349_v31 = vadd.f32 %v2348_v4, %v2347_v14 }
 0x25a   : > { %v2107_v46 = vadd.f32 %v2104_v63, %v2064_v20  ;;  %v2248_v51 = vrot.slane %v2247_v9, 4  ;;  %v2255_v24 = vrot.slane %v2254_v10, 4  ;;  %v2330_v44 = vmul.f32 %v4997_v47, %v2323_v25  ;;  %v2276_v63 = vpop.permute.xlu0 %2275 }
 0x25b   : > { %v2097_v5 = vadd.f32 %v2096_v22, %v2095_v43  ;;  %v2139_v26 = vrot.slane %v2138_v19, 1  ;;  %v2147_v17 = vadd.f32 %v2146_v58, %v2145_v57  ;;  %v2189_v28 = vrot.slane %v2188_v40, 1 }
 0x25c   : > { %v2176_v60 = vadd.f32 %v2175_v6, %v5095_v54  ;;  %v2249_v13 = vadd.f32 %v2248_v51, %v2247_v9  ;;  %v2256_v37 = vadd.f32 %v2255_v24, %v2254_v10  ;;  %v2331_v1 = vmul.f32 %v4997_v47, %v2322_v53 }
 0x25d   : > { %v2106_v12 = vadd.f32 %v2097_v5, %v2057_v7  ;;  %v2150_v61 = vadd.f32 %v2147_v17, %v2107_v46  ;;  %v2190_v8 = vadd.f32 %v2189_v28, %v2188_v40  ;;  %v2333_v11 = vsel %vm2043_vm11, %v2330_v44, 0.0 }
 0x25e   : > { %v2182_v23 = vrot.slane %v2181_v32, 1  ;;  %v2350_v15 = vrot.slane %v2349_v31, 2  ;;  %v2334_v14 = vrot.slane %v2333_v11, 4  ;;  %v2340_v43 = vsel %vm2043_vm11, %v2331_v1, 0.0  ;;  %v2362_v44 = vpop.permute.xlu0 %2361 }
 0x25f   : > { %v2148_v22 = vadd.f32 %v5099_v62, %v5091_v55  ;;  %v2140_v57 = vadd.f32 %v2139_v26, %v2138_v19  ;;  %v2250_v54 = vrot.slane %v2249_v13, 2  ;;  %v2341_v6 = vrot.slane %v2340_v43, 4  ;;  %v2364_v55 = vpop.permute.xlu1 %2363 }
 0x260   : > { %v2266_v58 = vrot.slane %v5093_v3, 1  ;;  %v2309_v47 = vrot.slane %v5101_v38, 1  ;;  %v2257_v41 = vrot.slane %v2256_v37, 2  ;;  %v2279_v2 = vsel %vm1389_vm7, %v2276_v63, %v5010_v56 }
 0x261   : > { %v2191_v4 = vadd.f32 %v2176_v60, %v2148_v22  ;;  %v2149_v53 = vadd.f32 %v2140_v57, %v2106_v12  ;;  %v2193_v20 = vadd.f32 %v2190_v8, %v2150_v61  ;;  %v2217_v1 = vadd.f32 %v2216_v50, %v5072_v59 }
 0x262   : > { %v2183_v62 = vadd.f32 %v2182_v23, %v2181_v32  ;;  %v2351_v19 = vadd.f32 %v2350_v15, %v2349_v31  ;;  %v2335_v9 = vadd.f32 %v2334_v14, %v2333_v11  ;;  %v2280_v10 = vsel %vm1389_vm7, %v5041_v29, %v2276_v63 }
 0x263   : > { %v2251_v25 = vadd.f32 %v2250_v54, %v2249_v13  ;;  %v2342_v7 = vadd.f32 %v2341_v6, %v2340_v43  ;;  %v2287_v40 = vmul.f32 %v4999_v48, %v2280_v10  ;;  %v2288_v56 = vmul.f32 %v4999_v48, %v2279_v2 }
 0x264   : > { %v2267_v46 = vadd.f32 %v2266_v58, %v5093_v3  ;;  %v2310_v51 = vadd.f32 %v2309_v47, %v5101_v38  ;;  %v2258_v24 = vadd.f32 %v2257_v41, %v2256_v37  ;;  %v2367_v59 = vsel %vm1761_vm9, %v2364_v55, %v5103_v16 }
 0x265   : > { %v2227_v50 = vadd.f32 %v5068_v36, %v2193_v20  ;;  %v2225_v32 = vadd.f32 %v5088_v52, %v2191_v4  ;;  %v2290_v29 = vsel %vm2043_vm11, %v2287_v40, 0.0  ;;  %v2297_v31 = vsel %vm2043_vm11, %v2288_v56, 0.0 }
 0x266   : > { %v2192_v5 = vadd.f32 %v2183_v62, %v2149_v53  ;;  %v2352_v48 = vrot.slane %v2351_v19, 1  ;;  %v2336_v26 = vrot.slane %v2335_v9, 2  ;;  %v2291_v3 = vrot.slane %v2290_v29, 4 }
 0x267   : > { %v2252_v17 = vrot.slane %v2251_v25, 1  ;;  %v2343_v38 = vrot.slane %v2342_v7, 2  ;;  %v2298_v28 = vrot.slane %v2297_v31, 4  ;;  %v2375_v60 = vmul.f32 %v5001_v49, %v2367_v59 }
 0x268   : > { %v2259_v13 = vrot.slane %v2258_v24, 1  ;;  %v2292_v37 = vadd.f32 %v2291_v3, %v2290_v29  ;;  %v2365_v36 = vsel %vm1761_vm9, %v2362_v44, %v2364_v55  ;;  %v2366_v52 = vsel %vm1761_vm9, %v5103_v16, %v2362_v44 }
 0x269   : > { %v2270_v12 = vadd.f32 %v2267_v46, %v2227_v50  ;;  %v2299_v61 = vadd.f32 %v2298_v28, %v2297_v31  ;;  %v2390_v8 = vsel %vm2043_vm11, %v2375_v60, 0.0  ;;  %v2373_v11 = vmul.f32 %v5001_v49, %v2366_v52 }
 0x26a   : > { %v2337_v63 = vadd.f32 %v2336_v26, %v2335_v9  ;;  %v2293_v23 = vrot.slane %v2292_v37, 2  ;;  %v2391_v15 = vrot.slane %v2390_v8, 4  ;;  %v2374_v14 = vmul.f32 %v5001_v49, %v2365_v36 }
 0x26b   : > { %v2253_v43 = vadd.f32 %v2252_v17, %v2251_v25  ;;  %v2344_v22 = vadd.f32 %v2343_v38, %v2342_v7  ;;  %v2300_v57 = vrot.slane %v2299_v61, 2  ;;  %v2376_v54 = vsel %vm2043_vm11, %v2373_v11, 0.0 }
 0x26c   : > { %v2294_v6 = vadd.f32 %v2293_v23, %v2292_v37  ;;  %v2392_v58 = vadd.f32 %v2391_v15, %v2390_v8  ;;  %v2377_v47 = vrot.slane %v2376_v54, 4  ;;  %v2383_v16 = vsel %vm2043_vm11, %v2374_v14, 0.0 }
 0x26d   : > { %v2226_v41 = vadd.f32 %v2217_v1, %v2192_v5  ;;  %v2260_v2 = vadd.f32 %v2259_v13, %v2258_v24  ;;  %v2301_v4 = vadd.f32 %v2300_v57, %v2299_v61  ;;  %v2384_v53 = vrot.slane %v2383_v16, 4 }
 0x26e   : > { %v2338_v20 = vrot.slane %v2337_v63, 1  ;;  %v2295_v55 = vrot.slane %v2294_v6, 1  ;;  %v2393_v62 = vrot.slane %v2392_v58, 2  ;;  %v2378_v9 = vadd.f32 %v2377_v47, %v2376_v54 }
 0x26f   : > { %v2313_v10 = vadd.f32 %v2310_v51, %v2270_v12  ;;  %v2345_v49 = vrot.slane %v2344_v22, 1  ;;  %v2302_v25 = vrot.slane %v2301_v4, 1  ;;  %v2385_v7 = vadd.f32 %v2384_v53, %v2383_v16 }
 0x270   : > { %v2268_v40 = vadd.f32 %v2253_v43, %v2225_v32  ;;  %v2296_v56 = vadd.f32 %v2295_v55, %v2294_v6  ;;  %v2394_v46 = vadd.f32 %v2393_v62, %v2392_v58  ;;  %v2379_v59 = vrot.slane %v2378_v9, 2 }
 0x271   : > { %v2353_v50 = vadd.f32 %v2352_v48, %v2351_v19  ;;  %v2269_v29 = vadd.f32 %v2260_v2, %v2226_v41  ;;  %v2303_v31 = vadd.f32 %v2302_v25, %v2301_v4  ;;  %v2386_v44 = vrot.slane %v2385_v7, 2 }
 0x272   : > { %v2339_v1 = vadd.f32 %v2338_v20, %v2337_v63  ;;  %v2311_v24 = vadd.f32 %v2296_v56, %v2268_v40  ;;  %v2395_v5 = vrot.slane %v2394_v46, 1  ;;  %v2380_v26 = vadd.f32 %v2379_v59, %v2378_v9  ;;  %v5222_v9 = vld [vmem:[%s5460_s5 + $0x10] sm:$0x7] }
 0x273   : > { %v2346_v3 = vadd.f32 %v2345_v49, %v2344_v22  ;;  %v2312_v17 = vadd.f32 %v2303_v31, %v2269_v29  ;;  %v2387_v38 = vadd.f32 %v2386_v44, %v2385_v7  ;;  %v2356_v28 = vadd.f32 %v2353_v50, %v2313_v10  ;;  %v3909_v10 = vld [vmem:[%s5461_s6] sm:$0x7] }
 0x274   : > { %v2396_v51 = vadd.f32 %v2395_v5, %v2394_v46  ;;  %v2354_v60 = vadd.f32 %v2339_v1, %v2311_v24  ;;  %v2381_v13 = vrot.slane %v2380_v26, 1 }
 0x275   : > { %v2355_v37 = vadd.f32 %v2346_v3, %v2312_v17  ;;  %v2388_v32 = vrot.slane %v2387_v38, 1 }
 0x276   : > { %v2399_v36 = vadd.f32 %v2396_v51, %v2356_v28  ;;  %v2382_v52 = vadd.f32 %v2381_v13, %v2380_v26 }
 0x277   : > { %v2389_v12 = vadd.f32 %v2388_v32, %v2387_v38 }
 0x278   : > { %v4075_v19 = vmul.f32 -1.442695, %v2399_v36  ;;  %v2397_v48 = vadd.f32 %v2382_v52, %v2354_v60 }
 0x279   : > { %v2398_v61 = vadd.f32 %v2389_v12, %v2355_v37  ;;  %v4076_v12 = vld [vmem:[%s5460_s5 + $0x4] sm:$0x7] }
 0x27a   : > { %4537 = vpow2.f32 %v4075_v19  ;;  %v4073_v8 = vmul.f32 -1.442695, %v2397_v48 }
 0x27b   : > { %v4074_v11 = vmul.f32 -1.442695, %v2398_v61 }
 0x27c   : > { %4539 = vpow2.f32 %v4073_v8 }
 0x27d   : > { %4541 = vpow2.f32 %v4074_v11 }
 0x284   : > { %v4538_v63 = vpop.eup %4537 }
 0x285   : > { %v2411_v23 = vadd.f32 1.0, %v4538_v63 }
 0x286   : > { %v4540_v15 = vpop.eup %4539 }
 0x287   : > { %v4542_v14 = vpop.eup %4541  ;;  %4543 = vrcp.f32 %v2411_v23  ;;  %v2409_v43 = vadd.f32 1.0, %v4540_v15 }
 0x288   : > { %v2410_v22 = vadd.f32 1.0, %v4542_v14 }
 0x289   : > { %4545 = vrcp.f32 %v2409_v43 }
 0x28a   : > { %4547 = vrcp.f32 %v2410_v22 }
 0x291   : > { %v4544_v57 = vpop.eup %4543 }
 0x292   : > { %v2420_v54 = vmul.f32 %v4544_v57, %v4924_v30  ;;  %v2423_v6 = vmul.f32 %v4544_v57, %v4922_v27 }
 0x293   : > { %v4546_v58 = vpop.eup %4545 }
 0x294   : > { %v4548_v47 = vpop.eup %4547  ;;  %v2426_v16 = vmul.f32 %v2420_v54, %v4950_v0  ;;  %v2429_v41 = vmul.f32 %v2423_v6, %v4950_v0  ;;  %v2418_v2 = vmul.f32 %v4546_v58, %v4930_v34  ;;  %v2421_v4 = vmul.f32 %v4546_v58, %v4932_v35 }
 0x295   : > { %v2419_v53 = vmul.f32 %v4548_v47, %v4940_v42  ;;  %v2422_v20 = vmul.f32 %v4548_v47, %v4934_v39 }
 0x296   : > { %v5185_v55 = vmul.f32 %v2418_v2, %v4958_v21  ;;  %v5188_v30 = vmul.f32 %v2421_v4, %v4958_v21  ;;  %v4299_v27 = vpack.c.bf16 %v2429_v41, %v2426_v16  ;;  %v4427_v39 = vpack.i.bf16 %v2429_v41, %v2426_v16  ;;  %v2430_v4 = vld [vmem:[%s5460_s5] sm:$0x7] }
 0x297   : > { %v5191_v62 = vmul.f32 %v2419_v53, %v4968_v33  ;;  %v5194_v0 = vmul.f32 %v2422_v20, %v4968_v33  ;;  %v5465_v33 = vmov 0.0  }
 0x298   : > { %4300 = vmatpush3.bf16.msra.mxu0 %v4299_v27  ;;  %v4417_v34 = vpack.i.bf16 %v5188_v30, %v5185_v55  ;;  %v4296_v21 = vpack.c.bf16 %v5188_v30, %v5185_v55  ;;  %4235 = vmatprep.mubr.msk.f32.mxu0 %vm4568_vm12, %v5465_v33 }
 0x299   : > { %v4422_v35 = vpack.i.bf16 %v5194_v0, %v5191_v62  ;;  %4305 = vmatprep.subr.bf16.mxu0 %v4567_v45  ;;  %v4294_v42 = vpack.c.bf16 %v5194_v0, %v5191_v62 }
 0x29a   : > { %4418 = vrot.lane.b32.xlu0 %v4417_v34, %s4558_s9 }
 0x29b   : > { %4423 = vrot.lane.b32.xlu1 %v4422_v35, %s4558_s9  ;;  %4236 = vmatmul.mubr.msk.f32.vlgmr.msra.gmra.mrb[4].mxu0 %vm2469_vm13, %v5222_v9 }
 0x29c   : > { %4242 = vmatprep.mubr.msk.f32.mxu0 %vm4568_vm12, %v5465_v33 }
 0x29e   : > { %4428 = vrot.lane.b32.xlu0 %v4427_v39, %s4558_s9 }
 0x29f   : > { %4433 = vrot.lane.b32.xlu1 %v4417_v34, %s4559_s10 }
 0x2a2   : > { %4438 = vrot.lane.b32.xlu0 %v4422_v35, %s4559_s10 }
 0x2a3   : > { %4443 = vrot.lane.b32.xlu1 %v4427_v39, %s4559_s10  ;;  %s278_s10 = scalar_lea.vmem %s5462_s7, %s4394_s22 }
 0x2a6   : > { %4448 = vrot.lane.b32.xlu0 %v4417_v34, %s4560_s11 }
 0x2a7   : > { %4453 = vrot.lane.b32.xlu1 %v4422_v35, %s4560_s11 }
 0x2aa   : > { %4458 = vrot.lane.b32.xlu0 %v4427_v39, %s4560_s11 }
 0x2ab   : > { %4463 = vrot.lane.b32.xlu1 %v4417_v34, %s4561_s12 }
 0x2ae   : > { %4468 = vrot.lane.b32.xlu0 %v4422_v35, %s4561_s12 }
 0x2af   : > { %4473 = vrot.lane.b32.xlu1 %v4427_v39, %s4561_s12 }
 0x2b2   : > { %4478 = vrot.lane.b32.xlu0 %v4422_v35, %s4562_s13 }
 0x2b3   : > { %4483 = vrot.lane.b32.xlu1 %v4427_v39, %s4562_s13 }
 0x2b6   : > { %4488 = vrot.lane.b32.xlu0 %v4417_v34, %s4562_s13 }
 0x2b7   : > { %4493 = vrot.lane.b32.xlu1 %v4422_v35, %s4563_s14 }
 0x2ba   : > { %4498 = vrot.lane.b32.xlu0 %v4427_v39, %s4563_s14 }
 0x2bb   : > { %4503 = vrot.lane.b32.xlu1 %v4417_v34, %s4563_s14 }
 0x2be   : > { %4508 = vrot.lane.b32.xlu0 %v4422_v35, %s4564_s15 }
 0x2bf   : > { %4513 = vrot.lane.b32.xlu1 %v4427_v39, %s4564_s15 }
 0x2c2   : > { %4518 = vrot.lane.b32.xlu0 %v4417_v34, %s4564_s15 }
 0x2c3   : > { %4523 = vrot.lane.b32.xlu1 %v4422_v35, %s4565_s16 }
 0x2c6   : > { %4528 = vrot.lane.b32.xlu0 %v4427_v39, %s4565_s16 }
 0x2c7   : > { %4533 = vrot.lane.b32.xlu1 %v4417_v34, %s4565_s16 }
 0x2ca   : > { %3912 = vperm.xlu0 %4415, %v3909_v10  }
 0x30c   : > { %v4419_v49 = vpop.permute.xlu0 %4418 }
 0x30d   : > { %v4421_v25 = vunpack.i.h.bf16 %v4419_v49  ;;  %v4420_v7 = vunpack.i.l.bf16 %v4419_v49  ;;  %v4424_v40 = vpop.permute.xlu1 %4423 }
 0x30e   : > { %v4426_v56 = vunpack.i.h.bf16 %v4424_v40  ;;  %v4425_v46 = vunpack.i.l.bf16 %v4424_v40 }
 0x310   : > { %v4429_v59 = vpop.permute.xlu0 %4428  ;;  %v2465_v50 = vsel %vm306_vm1, %v4420_v7, %v4425_v46  ;;  %v2466_v29 = vsel %vm306_vm1, %v4421_v25, %v4426_v56 }
 0x311   : > { %v4431_v31 = vunpack.i.h.bf16 %v4429_v59  ;;  %v4430_v44 = vunpack.i.l.bf16 %v4429_v59  ;;  %v4434_v1 = vpop.permute.xlu1 %4433  ;;  %v4266_v24 = vpack.c.bf16 %v2466_v29, %v2465_v50 }
 0x312   : > { %v4436_v17 = vunpack.i.h.bf16 %v4434_v1  ;;  %v4435_v38 = vunpack.i.l.bf16 %v4434_v1 }
 0x313   : > { %v2467_v5 = vsel %vm306_vm1, %v4430_v44, %v4420_v7  ;;  %v2468_v26 = vsel %vm306_vm1, %v4431_v31, %v4421_v25  ;;  %4267 = vmatprep.subr.bf16.mxu1 %v4266_v24  ;;  %v2463_v51 = vsel %vm306_vm1, %v4425_v46, %v4430_v44  ;;  %v2464_v60 = vsel %vm306_vm1, %v4426_v56, %v4431_v31  ;;  %v4081_v24 = vld [vmem:[%s5460_s5 + $0x8] sm:$0x7] }
 0x314   : > { %v4268_v3 = vpack.c.bf16 %v2468_v26, %v2467_v5  ;;  %v4439_v28 = vpop.permute.xlu0 %4438  ;;  %v4271_v61 = vpack.c.bf16 %v2464_v60, %v2463_v51 }
 0x315   : > { %v4441_v13 = vunpack.i.h.bf16 %v4439_v28  ;;  %v4440_v37 = vunpack.i.l.bf16 %v4439_v28  ;;  %v4444_v32 = vpop.permute.xlu1 %4443 }
 0x316   : > { %v4446_v36 = vunpack.i.h.bf16 %v4444_v32  ;;  %v4445_v52 = vunpack.i.l.bf16 %v4444_v32  ;;  %4269 = vmatpush1.bf16.msra.mxu1 %v4268_v3 }
 0x317   : > { %4270 = vmatprep.subr.bf16.mxu1 %v4567_v45  ;;  %v2445_v19 = vsel %vm293_vm3, %v4435_v38, %v4440_v37  ;;  %v2446_v48 = vsel %vm293_vm3, %v4436_v17, %v4441_v13 }
 0x318   : > { %v4449_v8 = vpop.permute.xlu0 %4448  ;;  %v2447_v11 = vsel %vm293_vm3, %v4445_v52, %v4435_v38  ;;  %v2448_v63 = vsel %vm293_vm3, %v4446_v36, %v4436_v17  ;;  %v4273_v57 = vpack.c.bf16 %v2446_v48, %v2445_v19  ;;  %v2444_v58 = vsel %vm293_vm3, %v4441_v13, %v4446_v36 }
 0x319   : > { %v4451_v23 = vunpack.i.h.bf16 %v4449_v8  ;;  %v4454_v15 = vpop.permute.xlu1 %4453  ;;  %4077 = vmatmul.mubr.msk.f32.vlgmr.msra.gmra.mrb[2].mxu1 %vm2469_vm13, %v4076_v12  ;;  %v4450_v14 = vunpack.i.l.bf16 %v4449_v8  ;;  %v4275_v54 = vpack.c.bf16 %v2448_v63, %v2447_v11  ;;  %v2443_v47 = vsel %vm293_vm3, %v4440_v37, %v4445_v52 }
 0x31a   : > { %v4456_v43 = vunpack.i.h.bf16 %v4454_v15  ;;  %v4455_v22 = vunpack.i.l.bf16 %v4454_v15  ;;  %4272 = vmatpush3.bf16.msra.mxu1 %v4271_v61  ;;  %4207 = vmatprep.mubr.msk.f32.mxu1 %vm4568_vm12, %v5465_v33  ;;  %v4278_v27 = vpack.c.bf16 %v2444_v58, %v2443_v47 }
 0x31b   : > { %4274 = vmatprep.subr.bf16.mxu1 %v4273_v57 }
 0x31c   : > { %v4459_v6 = vpop.permute.xlu0 %4458  ;;  %v2774_v53 = vsel %vm655_vm4, %v4450_v14, %v4455_v22  ;;  %v2775_v20 = vsel %vm655_vm4, %v4451_v23, %v4456_v43 }
 0x31d   : > { %v4461_v16 = vunpack.i.h.bf16 %v4459_v6  ;;  %v4460_v41 = vunpack.i.l.bf16 %v4459_v6  ;;  %v4464_v2 = vpop.permute.xlu1 %4463  ;;  %4208 = vmatmul.mubr.msk.f32.vlgmr.msra.gmra.mrb[4].mxu1 %vm2469_vm13, %v4076_v12  ;;  %v4280_v49 = vpack.c.bf16 %v2775_v20, %v2774_v53  ;;  %v5337_v6 = vld [vmem:[%s5460_s5 + $0x14] sm:$0x7] }
 0x31e   : > { %4276 = vmatpush1.bf16.msra.mxu1 %v4275_v54  ;;  %2681 = vmatprep.mubr.f32.mxu1 %v5465_v33  ;;  %v4466_v40 = vunpack.i.h.bf16 %v4464_v2  ;;  %v4465_v46 = vunpack.i.l.bf16 %v4464_v2  ;;  %v4084_v54 = vld [vmem:[%s5460_s5 + $0xc] sm:$0x7] }
 0x31f   : > { %4277 = vmatprep.subr.bf16.mxu1 %v4567_v45  ;;  %v2776_v35 = vsel %vm655_vm4, %v4460_v41, %v4450_v14  ;;  %v2777_v39 = vsel %vm655_vm4, %v4461_v16, %v4451_v23  ;;  %v2772_v31 = vsel %vm655_vm4, %v4455_v22, %v4460_v41  ;;  %v2773_v44 = vsel %vm655_vm4, %v4456_v43, %v4461_v16 }
 0x320   : > { %v4469_v34 = vpop.permute.xlu0 %4468  ;;  %v4282_v56 = vpack.c.bf16 %v2777_v39, %v2776_v35  ;;  %v4285_v3 = vpack.c.bf16 %v2773_v44, %v2772_v31 }
 0x321   : > { %v4474_v10 = vpop.permute.xlu1 %4473  ;;  %4079 = vmatmul.mubr.msk.f32.vlgmr.msra.gmra.mrb[2].mxu1 %vm2469_vm13, %v2430_v4  ;;  %v4471_v25 = vunpack.i.h.bf16 %v4469_v34  ;;  %v4470_v7 = vunpack.i.l.bf16 %v4469_v34 }
 0x322   : > { %4279 = vmatpush3.bf16.msra.mxu1 %v4278_v27  ;;  %4214 = vmatprep.mubr.msk.f32.mxu1 %vm4568_vm12, %v5465_v33  ;;  %v4476_v59 = vunpack.i.h.bf16 %v4474_v10  ;;  %v4475_v50 = vunpack.i.l.bf16 %v4474_v10 }
 0x323   : > { %4281 = vmatprep.subr.bf16.mxu1 %v4280_v49  ;;  %v2941_v5 = vsel %vm841_vm5, %v4465_v46, %v4470_v7  ;;  %v2942_v26 = vsel %vm841_vm5, %v4466_v40, %v4471_v25 }
 0x324   : > { %v5291_v29 = vpop.permute.xlu0 %4478  ;;  %v2943_v17 = vsel %vm841_vm5, %v4475_v50, %v4465_v46  ;;  %v2944_v38 = vsel %vm841_vm5, %v4476_v59, %v4466_v40  ;;  %v4287_v36 = vpack.c.bf16 %v2942_v26, %v2941_v5  ;;  %v2940_v52 = vsel %vm841_vm5, %v4471_v25, %v4476_v59  ;;  %v4093_v40 = vld [vmem:[%s5460_s5 + $0x18] sm:$0x7] }
 0x325   : > { %v4484_v1 = vpop.permute.xlu1 %4483  ;;  %4215 = vmatmul.mubr.msk.f32.vlgmr.msra.gmra.mrb[6].mxu1 %vm2469_vm13, %v2430_v4  ;;  %v2939_v12 = vsel %vm841_vm5, %v4470_v7, %v4475_v50  ;;  %v4289_v61 = vpack.c.bf16 %v2944_v38, %v2943_v17  ;;  %v4481_v8 = vunpack.i.h.bf16 %v5291_v29  ;;  %v4480_v11 = vunpack.i.l.bf16 %v5291_v29  ;;  %v4096_v17 = vld [vmem:[%s5460_s5 + $0x1c] sm:$0x7] }
 0x326   : > { %4283 = vmatpush1.bf16.msra.mxu1 %v4282_v56  ;;  %2845 = vmatprep.mubr.f32.mxu1 %v5465_v33  ;;  %v4486_v28 = vunpack.i.h.bf16 %v4484_v1  ;;  %v4485_v60 = vunpack.i.l.bf16 %v4484_v1  ;;  %v4292_v58 = vpack.c.bf16 %v2940_v52, %v2939_v12 }
 0x327   : > { %4284 = vmatprep.subr.bf16.mxu1 %v4567_v45 }
 0x328   : > { %v4489_v51 = vpop.permute.xlu0 %4488  ;;  %v3255_v2 = vsel %vm1203_vm6, %v4480_v11, %v4485_v60  ;;  %v3256_v4 = vsel %vm1203_vm6, %v4481_v8, %v4486_v28 }
 0x329   : > { %v4491_v13 = vunpack.i.h.bf16 %v4489_v51  ;;  %v4490_v37 = vunpack.i.l.bf16 %v4489_v51  ;;  %v5311_v32 = vpop.permute.xlu1 %4493  ;;  %4082 = vmatmul.mubr.msk.f32.vlgmr.msra.gmra.mrb[2].mxu1 %vm2469_vm13, %v4081_v24  ;;  %v4301_v27 = vpack.c.bf16 %v3256_v4, %v3255_v2 }
 0x32a   : > { %4286 = vmatpush3.bf16.msra.mxu1 %v4285_v3  ;;  %4221 = vmatprep.mubr.msk.f32.mxu1 %vm4568_vm12, %v5465_v33  ;;  %v4496_v39 = vunpack.i.h.bf16 %v5311_v32  ;;  %v4495_v10 = vunpack.i.l.bf16 %v5311_v32 }
 0x32b   : > { %v3259_v19 = vsel %vm1203_vm6, %v4485_v60, %v4490_v37  ;;  %v3260_v48 = vsel %vm1203_vm6, %v4486_v28, %v4491_v13  ;;  %4288 = vmatprep.subr.bf16.mxu1 %v4287_v36  ;;  %v3257_v34 = vsel %vm1203_vm6, %v4490_v37, %v4480_v11  ;;  %v3258_v35 = vsel %vm1203_vm6, %v4491_v13, %v4481_v8  ;;  %v4099_v37 = vld [vmem:[%s5460_s5 + $0x20] sm:$0x7] }
 0x32c   : > { %v4306_v63 = vpack.c.bf16 %v3260_v48, %v3259_v19  ;;  %v4499_v23 = vpop.permute.xlu0 %4498  ;;  %v4303_v29 = vpack.c.bf16 %v3258_v35, %v3257_v34 }
 0x32d   : > { %v4501_v15 = vunpack.i.h.bf16 %v4499_v23  ;;  %v4500_v14 = vunpack.i.l.bf16 %v4499_v23  ;;  %v5326_v43 = vpop.permute.xlu1 %4503  ;;  %4222 = vmatmul.mubr.msk.f32.vlgmr.msra.gmra.mrb[8].mxu1 %vm2469_vm13, %v4081_v24 }
 0x32e   : > { %v4506_v22 = vunpack.i.h.bf16 %v5326_v43  ;;  %v4505_v57 = vunpack.i.l.bf16 %v5326_v43  ;;  %4290 = vmatpush1.bf16.msra.mxu1 %v4289_v61  ;;  %4307 = vmatpush3.bf16.msra.mxu0 %v4306_v63 }
 0x32f   : > { %3012 = vmatprep.mubr.f32.mxu1 %v5465_v33  ;;  %4291 = vmatprep.subr.bf16.mxu1 %v4567_v45  ;;  %v3422_v56 = vsel %vm1389_vm7, %v4495_v10, %v4500_v14  ;;  %v3423_v46 = vsel %vm1389_vm7, %v4496_v39, %v4501_v15 }
 0x330   : > { %v3427_v47 = vsel %vm1389_vm7, %v4501_v15, %v4506_v22  ;;  %v3426_v16 = vsel %vm1389_vm7, %v4500_v14, %v4505_v57  ;;  %v5349_v41 = vpop.permute.xlu0 %4508  ;;  %4312 = vmatprep.subr.bf16.mxu0 %v4567_v45  ;;  %v4308_v1 = vpack.c.bf16 %v3423_v46, %v3422_v56  ;;  %v3424_v28 = vsel %vm1389_vm7, %v4505_v57, %v4495_v10 }
 0x331   : > { %v4313_v53 = vpack.c.bf16 %v3427_v47, %v3426_v16  ;;  %v4514_v20 = vpop.permute.xlu1 %4513  ;;  %4085 = vmatmul.mubr.msk.f32.vlgmr.msra.gmra.mrb[2].mxu1 %vm2469_vm13, %v4084_v54  ;;  %4243 = vmatmul.mubr.msk.f32.vlgmr.msra.gmra.mrb[6].mxu0 %vm2469_vm13, %v5337_v6  ;;  %v4511_v24 = vunpack.i.h.bf16 %v5349_v41  ;;  %v4510_v5 = vunpack.i.l.bf16 %v5349_v41  ;;  %v3425_v51 = vsel %vm1389_vm7, %v4506_v22, %v4496_v39 }
 0x332   : > { %4293 = vmatpush3.bf16.msra.mxu1 %v4292_v58  ;;  %4228 = vmatprep.mubr.msk.f32.mxu1 %vm4568_vm12, %v5465_v33  ;;  %v4516_v25 = vunpack.i.h.bf16 %v4514_v20  ;;  %v4515_v62 = vunpack.i.l.bf16 %v4514_v20  ;;  %v4310_v32 = vpack.c.bf16 %v3425_v51, %v3424_v28 }
 0x333   : > { %4314 = vmatpush3.bf16.msra.mxu0 %v4313_v53  ;;  %4295 = vmatprep.subr.bf16.mxu1 %v4294_v42 }
 0x334   : > { %v4519_v49 = vpop.permute.xlu0 %4518  ;;  %4249 = vmatprep.mubr.msk.f32.mxu0 %vm4568_vm12, %v5465_v33  ;;  %4319 = vmatprep.subr.bf16.mxu0 %v4567_v45  ;;  %v3590_v13 = vsel %vm1575_vm8, %v4511_v24, %v4516_v25 }
 0x335   : > { %v4521_v0 = vunpack.i.h.bf16 %v4519_v49  ;;  %v4520_v42 = vunpack.i.l.bf16 %v4519_v49  ;;  %v5373_v7 = vpop.permute.xlu1 %4523  ;;  %4229 = vmatmul.mubr.msk.f32.vlgmr.msra.gmra.mrb[10].mxu1 %vm2469_vm13, %v4084_v54 }
 0x336   : > { %4297 = vmatpush1.bf16.msra.mxu1 %v4296_v21  ;;  %3161 = vmatprep.mubr.f32.mxu1 %v5465_v33  ;;  %v4526_v52 = vunpack.i.h.bf16 %v5373_v7  ;;  %v4525_v12 = vunpack.i.l.bf16 %v5373_v7 }
 0x337   : > { %v3593_v59 = vsel %vm1575_vm8, %v4515_v62, %v4520_v42  ;;  %v3594_v50 = vsel %vm1575_vm8, %v4516_v25, %v4521_v0  ;;  %4302 = vmatprep.subr.bf16.mxu1 %v4301_v27  ;;  %4250 = vmatmul.mubr.msk.f32.vlgmr.msra.gmra.mrb[8].mxu0 %vm2469_vm13, %v4093_v40  ;;  %v3591_v19 = vsel %vm1575_vm8, %v4520_v42, %v4510_v5 }
 0x338   : > { %v4320_v31 = vpack.c.bf16 %v3594_v50, %v3593_v59  ;;  %v4529_v44 = vpop.permute.xlu0 %4528  ;;  %4256 = vmatprep.mubr.msk.f32.mxu0 %vm4568_vm12, %v5465_v33  ;;  %v3592_v48 = vsel %vm1575_vm8, %v4521_v0, %v4511_v24 }
 0x339   : > { %v4531_v55 = vunpack.i.h.bf16 %v4529_v44  ;;  %v4530_v30 = vunpack.i.l.bf16 %v4529_v44  ;;  %v4534_v21 = vpop.permute.xlu1 %4533  ;;  %4088 = vmatmul.mubr.msk.f32.vlgmr.msra.gmra.mrb[2].mxu1 %vm2469_vm13, %v5222_v9  ;;  %v4317_v11 = vpack.c.bf16 %v3592_v48, %v3591_v19 }
 0x33a   : > { %v4536_v26 = vunpack.i.h.bf16 %v4534_v21  ;;  %v4535_v3 = vunpack.i.l.bf16 %v4534_v21  ;;  %4304 = vmatpush1.bf16.msra.mxu1 %v4303_v29  ;;  %4321 = vmatpush3.bf16.msra.mxu0 %v4320_v31 }
 0x33b   : > { %4309 = vmatprep.subr.bf16.mxu1 %v4308_v1  ;;  %4326 = vmatprep.subr.bf16.mxu0 %v4567_v45  ;;  %v3589_v45 = vsel %vm1575_vm8, %v4510_v5, %v4515_v62  ;;  %v3756_v61 = vsel %vm1761_vm9, %v4525_v12, %v4530_v30  ;;  %v3757_v8 = vsel %vm1761_vm9, %v4526_v52, %v4531_v55 }
 0x33c   : > { %v3761_v9 = vsel %vm1761_vm9, %v4531_v55, %v4536_v26  ;;  %v3760_v38 = vsel %vm1761_vm9, %v4530_v30, %v4535_v3  ;;  %3328 = vmatprep.mubr.f32.mxu1 %v5465_v33  ;;  %v4315_v36 = vpack.c.bf16 %v3590_v13, %v3589_v45  ;;  %v4322_v63 = vpack.c.bf16 %v3757_v8, %v3756_v61 }
 0x33d   : > { %v4327_v60 = vpack.c.bf16 %v3761_v9, %v3760_v38  ;;  %4257 = vmatmul.mubr.msk.f32.vlgmr.msra.gmra.mrb[10].mxu0 %vm2469_vm13, %v4096_v17  ;;  %v3758_v23 = vsel %vm1761_vm9, %v4535_v3, %v4525_v12  ;;  %v3759_v15 = vsel %vm1761_vm9, %v4536_v26, %v4526_v52 }
 0x33e   : > { %4263 = vmatprep.mubr.msk.f32.mxu0 %vm4568_vm12, %v5465_v33  ;;  %v4324_v14 = vpack.c.bf16 %v3759_v15, %v3758_v23 }
 0x33f   : > { %4328 = vmatpush3.bf16.msra.mxu0 %v4327_v60 }
 0x341   : > { %4091 = vmatmul.mubr.msk.f32.vlgmr.msra.gmra.mrb[2].mxu1 %vm2469_vm13, %v5337_v6 }
 0x342   : > { %4311 = vmatpush1.bf16.msra.mxu1 %v4310_v32  ;;  %4264 = vmatmul.mubr.msk.f32.vlgmr.msra.gmra.mrb[12].mxu0 %vm2469_vm13, %v4099_v37 }
 0x343   : > { %4316 = vmatprep.subr.bf16.mxu1 %v4315_v36  ;;  %3495 = vmatprep.mubr.f32.mxu1 %v5465_v33 }
 0x349   : > { %4094 = vmatmul.mubr.msk.f32.vlgmr.msra.gmra.mrb[2].mxu1 %vm2469_vm13, %v4093_v40  ;;  %v3913_v40 = vpop.permute.xlu0 %3912 }
 0x34a   : > { %4318 = vmatpush1.bf16.msra.mxu1 %v4317_v11  ;;  %3662 = vmatprep.mubr.f32.mxu1 %v5465_v33 }
 0x34b   : > { %4323 = vmatprep.subr.bf16.mxu1 %v4322_v63 }
 0x351   : > { %4097 = vmatmul.mubr.msk.f32.vlgmr.msra.gmra.mrb[2].mxu1 %vm2469_vm13, %v4096_v17 }
 0x352   : > { %4325 = vmatpush1.bf16.msra.mxu1 %v4324_v14  ;;  %3829 = vmatprep.mubr.f32.mxu1 %v5465_v33 }
 0x359   : > { %4100 = vmatmul.mubr.msk.f32.vlgmr.msra.gmra.mrb[2].mxu1 %vm2469_vm13, %v4099_v37 }
 0x36e   : > { %v3234_v43 = vpop.f32.mrb[4].mxu0 }
 0x36f   : > { %v4237_v22 = vpop.f32.mrb[5].mxu0 }
 0x3f0   : > { %v2610_v57 = vpop.f32.mrb[4].mxu1 }
 0x3f1   : > { %v4209_v54 = vpop.f32.mrb[5].mxu1 }
 0x3f8   : > { %v2754_v6 = vpop.f32.mrb[6].mxu1 }
 0x3f9   : > { %v2755_v58 = vadd.f32 %v2754_v6, %v2610_v57  ;;  %v4216_v47 = vpop.f32.mrb[7].mxu1 }
 0x400   : > { %v2918_v16 = vpop.f32.mrb[8].mxu1 }
 0x401   : > { %v2924_v41 = vadd.f32 %v2918_v16, %v2755_v58  ;;  %v4223_v18 = vpop.f32.mrb[9].mxu1 }
 0x404   : > { %v3401_v2 = vpop.f32.mrb[6].mxu0 }
 0x405   : > { %v4244_v4 = vpop.f32.mrb[7].mxu0 }
 0x408   : > { %v3085_v53 = vpop.f32.mrb[10].mxu1 }
 0x409   : > { %v3091_v20 = vadd.f32 %v3085_v53, %v2924_v41  ;;  %v4230_v27 = vpop.f32.mrb[11].mxu1 }
 0x40a   : > { %v3568_v33 = vpop.f32.mrb[8].mxu0 }
 0x40b   : > { %v3240_v34 = vadd.f32 %v3234_v43, %v3091_v20  ;;  %v4251_v35 = vpop.f32.mrb[9].mxu0 }
 0x40d   : > { %v3407_v39 = vadd.f32 %v3401_v2, %v3240_v34 }
 0x40f   : > { %v3574_v10 = vadd.f32 %v3568_v33, %v3407_v39 }
 0x410   : > { %v3735_v49 = vpop.f32.mrb[10].mxu0 }
 0x411   : > { %v3741_v25 = vadd.f32 %v3735_v49, %v3574_v10  ;;  %v4258_v62 = vpop.f32.mrb[11].mxu0 }
 0x415   : > { %v3902_v0 = vpop.f32.mrb[12].mxu0 }
 0x416   : > { %v3908_v42 = vadd.f32 %v3902_v0, %v3741_v25  ;;  %v4265_v7 = vpop.f32.mrb[13].mxu0 }
 0x418   : > { %v3917_v56 = vadd.f32 %v3913_v40, %v3908_v42 }
 0x41a   : > { %3923 = vst [vmem:[%s278_s10 + $0x8] sm:$0x7] %v3917_v56 }
 0x42c   : > { %v3831_v46 = vpop.f32.mrb[2].mxu1 }
 0x42d   : > { %v3915_v59 = vadd.f32 %v3913_v40, %v3831_v46  ;;  %v3833_v50 = vpop.f32.mrb[3].mxu1 }
 0x42e   : > { %v3916_v29 = vadd.f32 %v3913_v40, %v3833_v50 }
 0x430   : > { %v3920_v31 = vcombine.low %v3915_v59, %v3916_v29 }
 0x432   : > { %3922 = vst [vmem:[%s278_s10] sm:$0x77] %v3920_v31 }
 0x433 PF: > { %s17_s24 = sadd.s32 1, %s4555_s24  }
 0x434   : > { %p14_p4 = scmp.ge.s32.totalorder %s17_s24, 4  }
 0x436   :  { %16 = sbr.rel (!%p14_p4) target bundleno = 1 (0x1), region = 102 }

</bundles_post_ra>
